<compile_context>
chip_gen: v6e
topology: v6e:2x2x1
jax: 0.10.0
libtpu: 0.0.40
codegen_flags: <defaults>
</compile_context>

<pallas_src>
import functools

import jax
import jax.numpy as jnp
from jax.experimental import pallas as pl
from jax.experimental.pallas import tpu as pltpu

# ---------------- small config, consistent with the module ----------------
B = 2             # batch
T = 8             # question length (seq)
TOKEN_SIZE = 50
WORD_EMBED = 16   # __C.WORD_EMBED_SIZE
HIDDEN = 32       # __C.HIDDEN_SIZE
N_OBJ = 8         # number of object proposals
OBJ_FEAT = 64     # __C.FEAT_SIZE['OBJ_FEAT_SIZE'][1]
BBOX_FEAT = 5     # __C.FEAT_SIZE['BBOX_FEAT_SIZE'][1]
BBOX_EMB = 16     # __C.BBOXFEAT_EMB_SIZE
FLAT_OUT = 64     # __C.FLAT_OUT_SIZE
ANSWER_SIZE = 10
USE_BBOX_FEAT = True   # config path implemented (bbox-off would just drop one matmul)


def _align8(n):
    return (n + 7) // 8 * 8


# -------- packed-slab row offsets (compile-time constants, 8-row aligned) --------
# Slab A (lane width 4H = 128): LSTM
A_IH = 0                                  # (TOKEN_SIZE, 4H) = emb @ W_ih  (gates i|f|g|o on lanes)
A_WHH = _align8(TOKEN_SIZE)               # (HIDDEN, 4H)     = W_hh
A_BL = A_WHH + HIDDEN                     # (1, 4H)          = b_ih + b_hh
A_ROWS = A_BL + 1

# Slab B (lane width HIDDEN = 32): adapter + TDA weights, 1-row biases at the tail
B_WOBJ = 0                                # (OBJ_FEAT, H)
B_WBBX = OBJ_FEAT                         # (BBOX_FEAT, H)   = w_bbox @ w_obj[bbox half]   (fold)
B_WAV = _align8(OBJ_FEAT + BBOX_FEAT)     # (H, H)           = w_v @ w_nonlin[:H]          (fold)
B_WAQ = B_WAV + HIDDEN                    # (H, H)           = w_q @ w_nonlin[H:]          (fold)
B_WQN = B_WAQ + HIDDEN                    # (H, H)           = w_qnet
B_WVN = B_WQN + HIDDEN                    # (H, H)           = w_vnet
B_BIAS = B_WVN + HIDDEN                   # 5 rows: b_adapter, b_attn, w_logit_row, b_qnet, b_vnet
B_ROWS = B_BIAS + 5

# Slab C (lane width FLAT_OUT = 64): classifier (2nd layer lane-padded to FLAT_OUT)
C_W1 = 0                                  # (HIDDEN, FLAT_OUT)
C_B1 = HIDDEN                             # (1, FLAT_OUT)
C_W2 = _align8(HIDDEN + 1)                # (FLAT_OUT, FLAT_OUT), cols >= ANSWER_SIZE are zero
C_B2 = C_W2 + FLAT_OUT                    # (1, FLAT_OUT)
C_ROWS = C_B2 + 1


# --------------------------- single fused kernel ----------------------------
def _net_kernel(ix_ref, obj_ref, bbox_ref, lstm_ref, wh_ref, cls_ref, out_ref,
                *, batch, seq, n_obj):
    f32 = jnp.float32
    H = HIDDEN
    tb = seq * batch

    # ---- embedding lookup fused with the LSTM input projection ----
    # lang_feat @ W_ih == onehot(ques_ix) @ (emb @ W_ih)  (folded offline).
    ix = ix_ref[...]                                               # (T*B, 1) int32, time-major
    onehot = (jax.lax.broadcasted_iota(jnp.int32, (tb, TOKEN_SIZE), 1) == ix).astype(f32)
    ih_all = (jnp.dot(onehot, lstm_ref[A_IH:A_IH + TOKEN_SIZE, :],
                      preferred_element_type=f32)
              + lstm_ref[A_BL:A_BL + 1, :])                        # (T*B, 4H), bias pre-added

    # ---- LSTM (1 layer, batch_first), fully unrolled over T ----
    # One 128-lane recurrent matmul + 3 transcendentals per step.
    whh = lstm_ref[A_WHH:A_WHH + H, :]                             # (H, 4H)
    h = jnp.zeros((batch, H), f32)
    c = jnp.zeros((batch, H), f32)
    for t in range(seq):
        pre = (ih_all[t * batch:(t + 1) * batch, :]
               + jnp.dot(h, whh, preferred_element_type=f32))      # (B, 4H)
        s = jax.nn.sigmoid(pre)                                    # i, f, o gates
        g = jnp.tanh(pre)                                          # g gate
        c = s[:, H:2 * H] * c + s[:, 0:H] * g[:, 2 * H:3 * H]
        h = s[:, 3 * H:4 * H] * jnp.tanh(c)
    lang_last = h                                                  # == rnn(lang_feat)[0][:, -1]

    # ---- carve the hidden-size weight slab (static sub-slices) ----
    w_objf = wh_ref[B_WOBJ:B_WOBJ + OBJ_FEAT, :]
    w_bbxf = wh_ref[B_WBBX:B_WBBX + BBOX_FEAT, :]
    w_av = wh_ref[B_WAV:B_WAV + H, :]
    w_aq = wh_ref[B_WAQ:B_WAQ + H, :]
    w_qn = wh_ref[B_WQN:B_WQN + H, :]
    w_vn = wh_ref[B_WVN:B_WVN + H, :]
    b_ad = wh_ref[B_BIAS + 0:B_BIAS + 1, :]
    b_at = wh_ref[B_BIAS + 1:B_BIAS + 2, :]
    w_lg = wh_ref[B_BIAS + 2:B_BIAS + 3, :]
    b_qn = wh_ref[B_BIAS + 3:B_BIAS + 4, :]
    b_vn = wh_ref[B_BIAS + 4:B_BIAS + 5, :]

    # ---- Adapter: bbox linear + concat + obj linear folded into split-K ----
    obj_h = (jnp.dot(obj_ref[...], w_objf, preferred_element_type=f32)
             + jnp.dot(bbox_ref[...], w_bbxf, preferred_element_type=f32)
             + b_ad)                                               # (B*N, H)
    obj_h3 = obj_h.reshape(batch, n_obj, H)

    # ---- TDA backbone (AttnMap + q_net/v_net join), batched over B ----
    # linear_v / linear_q are folded into the concat-MLP weights (exact).
    v_part = jnp.dot(obj_h, w_av, preferred_element_type=f32)      # (B*N, H)
    q_part = jnp.dot(lang_last, w_aq, preferred_element_type=f32)  # (B, H)
    hid = jnp.maximum(v_part.reshape(batch, n_obj, H)
                      + q_part[:, None, :]
                      + b_at.reshape(1, 1, H), 0.0)                # (B, N, H)
    # attention logits (scalar logit bias cancels inside softmax) + per-batch softmax
    w_lg_b = jnp.broadcast_to(w_lg.reshape(1, 1, H), (batch, 1, H))
    logits = jnp.einsum('bqh,bnh->bqn', w_lg_b, hid,
                        preferred_element_type=f32)                # (B, 1, N)
    m = jnp.max(logits, axis=-1, keepdims=True)
    e = jnp.exp(logits - m)
    att = e / jnp.sum(e, axis=-1, keepdims=True)                   # exact softmax weights
    atted = jnp.einsum('bqn,bnh->bqh', att, obj_h3,
                       preferred_element_type=f32).reshape(batch, H)   # (B, H)

    q_repr = jnp.maximum(jnp.dot(lang_last, w_qn, preferred_element_type=f32) + b_qn, 0.0)
    v_repr = jnp.maximum(jnp.dot(atted, w_vn, preferred_element_type=f32) + b_vn, 0.0)
    joint = q_repr * v_repr                                        # (B, H)

    # ---- classifier: Linear + ReLU + Dropout(identity) + Linear ----
    h1 = jnp.maximum(jnp.dot(joint, cls_ref[C_W1:C_W1 + HIDDEN, :],
                             preferred_element_type=f32)
                     + cls_ref[C_B1:C_B1 + 1, :], 0.0)             # (B, FLAT_OUT)
    proj = (jnp.dot(h1, cls_ref[C_W2:C_W2 + FLAT_OUT, :], preferred_element_type=f32)
            + cls_ref[C_B2:C_B2 + 1, :])                           # (B, FLAT_OUT), lane-padded
    out_ref[...] = proj[:, :ANSWER_SIZE].astype(out_ref.dtype)


# ------------------------------- parameters --------------------------------
def init_params(key):
    ks = jax.random.split(key, 13)

    def lin(k, fan_in, fan_out):
        kw, kb = jax.random.split(k)
        lim = 1.0 / jnp.sqrt(jnp.float32(fan_in))
        w = jax.random.uniform(kw, (fan_in, fan_out), jnp.float32, -lim, lim)
        b = jax.random.uniform(kb, (fan_out,), jnp.float32, -lim, lim)
        return w, b

    p = {}
    p['emb'] = jax.random.normal(ks[0], (TOKEN_SIZE, WORD_EMBED), jnp.float32) * 0.1
    p['w_ih'], p['b_ih'] = lin(ks[1], WORD_EMBED, 4 * HIDDEN)      # gate order i|f|g|o
    p['w_hh'], p['b_hh'] = lin(ks[2], HIDDEN, 4 * HIDDEN)
    p['w_bbox'], p['b_bbox'] = lin(ks[3], BBOX_FEAT, BBOX_EMB)
    p['w_obj'], p['b_obj'] = lin(ks[4], OBJ_FEAT + BBOX_EMB, HIDDEN)
    # TDA / AttnMap (weight_norm(dim=None): g == ||v||_F at init -> identity fold)
    p['w_v'], p['b_v'] = lin(ks[5], HIDDEN, HIDDEN)
    p['w_q'], p['b_q'] = lin(ks[6], HIDDEN, HIDDEN)
    p['w_n'], p['b_n'] = lin(ks[7], 2 * HIDDEN, HIDDEN)
    p['w_l'], p['b_l'] = lin(ks[8], HIDDEN, 1)
    p['w_qnet'], p['b_qnet'] = lin(ks[9], HIDDEN, HIDDEN)
    p['w_vnet'], p['b_vnet'] = lin(ks[10], HIDDEN, HIDDEN)
    # classifier (weight_norm(dim=None) folded)
    p['w_c1'], p['b_c1'] = lin(ks[11], HIDDEN, FLAT_OUT)
    p['w_c2'], p['b_c2'] = lin(ks[12], FLAT_OUT, ANSWER_SIZE)
    return p


def pack_params(p):
    """Fold bias-free linear chains offline (exact) and pack into 3 lane-dense slabs."""
    f32 = jnp.float32

    # Slab A: LSTM. emb @ W_ih folded into one (vocab, 4H) table.
    slab_a = jnp.zeros((A_ROWS, 4 * HIDDEN), f32)
    slab_a = slab_a.at[A_IH:A_IH + TOKEN_SIZE].set(p['emb'] @ p['w_ih'])
    slab_a = slab_a.at[A_WHH:A_WHH + HIDDEN].set(p['w_hh'])
    slab_a = slab_a.at[A_BL].set(p['b_ih'] + p['b_hh'])

    # Slab B: adapter + TDA.
    w_obj_f = p['w_obj'][:OBJ_FEAT]                 # obj-feature half
    w_obj_b = p['w_obj'][OBJ_FEAT:]                 # bbox-embedding half
    w_bbox_fold = p['w_bbox'] @ w_obj_b             # (BBOX_FEAT, H)
    b_adapter = p['b_bbox'] @ w_obj_b + p['b_obj']
    w_av = p['w_v'] @ p['w_n'][:HIDDEN]
    w_aq = p['w_q'] @ p['w_n'][HIDDEN:]
    b_attn = p['b_v'] @ p['w_n'][:HIDDEN] + p['b_q'] @ p['w_n'][HIDDEN:] + p['b_n']
    slab_b = jnp.zeros((B_ROWS, HIDDEN), f32)
    slab_b = slab_b.at[B_WOBJ:B_WOBJ + OBJ_FEAT].set(w_obj_f)
    slab_b = slab_b.at[B_WBBX:B_WBBX + BBOX_FEAT].set(w_bbox_fold)
    slab_b = slab_b.at[B_WAV:B_WAV + HIDDEN].set(w_av)
    slab_b = slab_b.at[B_WAQ:B_WAQ + HIDDEN].set(w_aq)
    slab_b = slab_b.at[B_WQN:B_WQN + HIDDEN].set(p['w_qnet'])
    slab_b = slab_b.at[B_WVN:B_WVN + HIDDEN].set(p['w_vnet'])
    slab_b = slab_b.at[B_BIAS + 0].set(b_adapter)
    slab_b = slab_b.at[B_BIAS + 1].set(b_attn)
    slab_b = slab_b.at[B_BIAS + 2].set(p['w_l'][:, 0])   # logit weight row; b_l is softmax-invariant
    slab_b = slab_b.at[B_BIAS + 3].set(p['b_qnet'])
    slab_b = slab_b.at[B_BIAS + 4].set(p['b_vnet'])

    # Slab C: classifier (2nd layer lane-padded from ANSWER_SIZE to FLAT_OUT).
    slab_c = jnp.zeros((C_ROWS, FLAT_OUT), f32)
    slab_c = slab_c.at[C_W1:C_W1 + HIDDEN].set(p['w_c1'])
    slab_c = slab_c.at[C_B1].set(p['b_c1'])
    slab_c = slab_c.at[C_W2:C_W2 + FLAT_OUT, :ANSWER_SIZE].set(p['w_c2'])
    slab_c = slab_c.at[C_B2, :ANSWER_SIZE].set(p['b_c2'])
    return slab_a, slab_b, slab_c


# --------------------------------- forward ---------------------------------
def net_forward(slabs, obj_feat, bbox_feat, ques_ix):
    slab_a, slab_b, slab_c = slabs
    Bb, Tt = ques_ix.shape
    N = obj_feat.shape[1]

    obj_flat = obj_feat.astype(jnp.float32).reshape(Bb * N, -1)    # (B*N, OBJ_FEAT)
    bbox_flat = bbox_feat.astype(jnp.float32).reshape(Bb * N, -1)  # (B*N, BBOX_FEAT)
    # Time-major flattening so per-timestep rows are contiguous static slices.
    ix_t = ques_ix.astype(jnp.int32).T.reshape(Tt * Bb, 1)

    args = (ix_t, obj_flat, bbox_flat, slab_a, slab_b, slab_c)     # 6 DMAs total

    def full_spec(a):
        nd = a.ndim
        return pl.BlockSpec(a.shape, lambda i, _nd=nd: (0,) * _nd)

    kernel = functools.partial(_net_kernel, batch=Bb, seq=Tt, n_obj=N)

    return pl.pallas_call(
        kernel,
        grid=(1,),
        in_specs=[full_spec(a) for a in args],
        out_specs=pl.BlockSpec((Bb, ANSWER_SIZE), lambda i: (0, 0)),
        out_shape=jax.ShapeDtypeStruct((Bb, ANSWER_SIZE), jnp.float32),
        compiler_params=pltpu.CompilerParams(dimension_semantics=("arbitrary",)),
    )(*args)


if __name__ == "__main__":
    key = jax.random.PRNGKey(0)
    kp, k1, k2, k3 = jax.random.split(key, 4)
    params = init_params(kp)
    slabs = pack_params(params)

    obj_feat = jax.random.normal(k1, (B, N_OBJ, OBJ_FEAT), jnp.float32)
    obj_feat = obj_feat.at[:, -1, :].set(0.0)   # a padded object (mask path unused by Net.forward)
    bbox_feat = jax.random.normal(k2, (B, N_OBJ, BBOX_FEAT), jnp.float32)
    ques_ix = jax.random.randint(k3, (B, T), 0, TOKEN_SIZE)

    out = jax.jit(net_forward)(slabs, obj_feat, bbox_feat, ques_ix)
    out = jax.block_until_ready(out)
    assert out.shape == (B, ANSWER_SIZE), out.shape
    assert bool(jnp.all(jnp.isfinite(out)))
    print("KERNEL_OK")
</pallas_src>

<mosaic_0001>
module attributes {stable_mosaic.version = 11 : i64} {
  func.func @_net_kernel(%arg0: i32, %arg1: memref<16x1xi32, #tpu.memory_space<vmem>>, %arg2: memref<16x64xf32, #tpu.memory_space<vmem>>, %arg3: memref<16x5xf32, #tpu.memory_space<vmem>>, %arg4: memref<89x128xf32, #tpu.memory_space<vmem>>, %arg5: memref<205x32xf32, #tpu.memory_space<vmem>>, %arg6: memref<105x64xf32, #tpu.memory_space<vmem>>, %arg7: memref<2x10xf32, #tpu.memory_space<vmem>>) attributes {dimension_semantics = [#tpu.dimension_semantics<arbitrary>], iteration_bounds = array<i64: 1>, scalar_prefetch = 0 : i64, scratch_operands = 0 : i64, tpu.core_type = #tpu.core_type<tc>, window_params = [{pipeline_mode = #tpu.pipeline_mode<synchronous>, transform_indices = @transform_0, window_bounds = array<i64: 16, 1>}, {pipeline_mode = #tpu.pipeline_mode<synchronous>, transform_indices = @transform_1, window_bounds = array<i64: 16, 64>}, {pipeline_mode = #tpu.pipeline_mode<synchronous>, transform_indices = @transform_2, window_bounds = array<i64: 16, 5>}, {pipeline_mode = #tpu.pipeline_mode<synchronous>, transform_indices = @transform_3, window_bounds = array<i64: 89, 128>}, {pipeline_mode = #tpu.pipeline_mode<synchronous>, transform_indices = @transform_4, window_bounds = array<i64: 205, 32>}, {pipeline_mode = #tpu.pipeline_mode<synchronous>, transform_indices = @transform_5, window_bounds = array<i64: 105, 64>}, {pipeline_mode = #tpu.pipeline_mode<synchronous>, transform_indices = @transform_6, window_bounds = array<i64: 2, 10>}]} {
    %c0 = arith.constant 0 : index
    %c0_0 = arith.constant 0 : index
    %0 = vector.load %arg1[%c0, %c0_0] : memref<16x1xi32, #tpu.memory_space<vmem>>, vector<16x1xi32>
    %1 = tpu.iota {dimensions = array<i32: 1>} : vector<16x50xi32>
    %2 = vector.broadcast %0 : vector<16x1xi32> to vector<16x50xi32>
    %3 = arith.cmpi eq, %1, %2 : vector<16x50xi32>
    %4 = arith.extui %3 : vector<16x50xi1> to vector<16x50xi32>
    %5 = arith.sitofp %4 : vector<16x50xi32> to vector<16x50xf32>
    %c0_1 = arith.constant 0 : index
    %c0_2 = arith.constant 0 : index
    %6 = vector.load %arg4[%c0_1, %c0_2] : memref<89x128xf32, #tpu.memory_space<vmem>>, vector<50x128xf32>
    %cst = arith.constant dense<0.000000e+00> : vector<16x128xf32>
    %7 = tpu.matmul %5, %6, %cst {dimension_numbers = #tpu.dot_dimension_numbers<[1], [0], [0], [1], [0, 0, 1, 1], [], []>} : vector<16x50xf32>, vector<50x128xf32>, vector<16x128xf32> -> vector<16x128xf32>
    %c88 = arith.constant 88 : index
    %c0_3 = arith.constant 0 : index
    %8 = vector.load %arg4[%c88, %c0_3] : memref<89x128xf32, #tpu.memory_space<vmem>>, vector<1x128xf32>
    %9 = vector.broadcast %8 : vector<1x128xf32> to vector<16x128xf32>
    %10 = arith.addf %7, %9 : vector<16x128xf32>
    %c56 = arith.constant 56 : index
    %c0_4 = arith.constant 0 : index
    %11 = vector.load %arg4[%c56, %c0_4] : memref<89x128xf32, #tpu.memory_space<vmem>>, vector<32x128xf32>
    %cst_5 = arith.constant 0.000000e+00 : f32
    %12 = vector.broadcast %cst_5 : f32 to vector<2x32xf32>
    %cst_6 = arith.constant 0.000000e+00 : f32
    %13 = vector.broadcast %cst_6 : f32 to vector<2x32xf32>
    %14 = vector.extract_strided_slice %10 {offsets = [0, 0], sizes = [2, 128], strides = [1, 1]} : vector<16x128xf32> to vector<2x128xf32>
    %cst_7 = arith.constant dense<0.000000e+00> : vector<2x128xf32>
    %15 = tpu.matmul %12, %11, %cst_7 {dimension_numbers = #tpu.dot_dimension_numbers<[1], [0], [0], [1], [0, 0, 1, 1], [], []>} : vector<2x32xf32>, vector<32x128xf32>, vector<2x128xf32> -> vector<2x128xf32>
    %16 = arith.addf %14, %15 : vector<2x128xf32>
    %17 = arith.negf %16 : vector<2x128xf32>
    %18 = math.exp %17 : vector<2x128xf32>
    %cst_8 = arith.constant 1.000000e+00 : f32
    %19 = vector.broadcast %cst_8 : f32 to vector<2x128xf32>
    %20 = arith.addf %19, %18 : vector<2x128xf32>
    %21 = arith.divf %19, %20 : vector<2x128xf32>
    %22 = math.tanh %16 : vector<2x128xf32>
    %23 = vector.extract_strided_slice %21 {offsets = [0, 32], sizes = [2, 32], strides = [1, 1]} : vector<2x128xf32> to vector<2x32xf32>
    %24 = arith.mulf %23, %13 : vector<2x32xf32>
    %25 = vector.extract_strided_slice %21 {offsets = [0, 0], sizes = [2, 32], strides = [1, 1]} : vector<2x128xf32> to vector<2x32xf32>
    %26 = vector.extract_strided_slice %22 {offsets = [0, 64], sizes = [2, 32], strides = [1, 1]} : vector<2x128xf32> to vector<2x32xf32>
    %27 = arith.mulf %25, %26 : vector<2x32xf32>
    %28 = arith.addf %24, %27 : vector<2x32xf32>
    %29 = vector.extract_strided_slice %21 {offsets = [0, 96], sizes = [2, 32], strides = [1, 1]} : vector<2x128xf32> to vector<2x32xf32>
    %30 = math.tanh %28 : vector<2x32xf32>
    %31 = arith.mulf %29, %30 : vector<2x32xf32>
    %32 = vector.extract_strided_slice %10 {offsets = [2, 0], sizes = [2, 128], strides = [1, 1]} : vector<16x128xf32> to vector<2x128xf32>
    %cst_9 = arith.constant dense<0.000000e+00> : vector<2x128xf32>
    %33 = tpu.matmul %31, %11, %cst_9 {dimension_numbers = #tpu.dot_dimension_numbers<[1], [0], [0], [1], [0, 0, 1, 1], [], []>} : vector<2x32xf32>, vector<32x128xf32>, vector<2x128xf32> -> vector<2x128xf32>
    %34 = arith.addf %32, %33 : vector<2x128xf32>
    %35 = arith.negf %34 : vector<2x128xf32>
    %36 = math.exp %35 : vector<2x128xf32>
    %cst_10 = arith.constant 1.000000e+00 : f32
    %37 = vector.broadcast %cst_10 : f32 to vector<2x128xf32>
    %38 = arith.addf %37, %36 : vector<2x128xf32>
    %39 = arith.divf %37, %38 : vector<2x128xf32>
    %40 = math.tanh %34 : vector<2x128xf32>
    %41 = vector.extract_strided_slice %39 {offsets = [0, 32], sizes = [2, 32], strides = [1, 1]} : vector<2x128xf32> to vector<2x32xf32>
    %42 = arith.mulf %41, %28 : vector<2x32xf32>
    %43 = vector.extract_strided_slice %39 {offsets = [0, 0], sizes = [2, 32], strides = [1, 1]} : vector<2x128xf32> to vector<2x32xf32>
    %44 = vector.extract_strided_slice %40 {offsets = [0, 64], sizes = [2, 32], strides = [1, 1]} : vector<2x128xf32> to vector<2x32xf32>
    %45 = arith.mulf %43, %44 : vector<2x32xf32>
    %46 = arith.addf %42, %45 : vector<2x32xf32>
    %47 = vector.extract_strided_slice %39 {offsets = [0, 96], sizes = [2, 32], strides = [1, 1]} : vector<2x128xf32> to vector<2x32xf32>
    %48 = math.tanh %46 : vector<2x32xf32>
    %49 = arith.mulf %47, %48 : vector<2x32xf32>
    %50 = vector.extract_strided_slice %10 {offsets = [4, 0], sizes = [2, 128], strides = [1, 1]} : vector<16x128xf32> to vector<2x128xf32>
    %cst_11 = arith.constant dense<0.000000e+00> : vector<2x128xf32>
    %51 = tpu.matmul %49, %11, %cst_11 {dimension_numbers = #tpu.dot_dimension_numbers<[1], [0], [0], [1], [0, 0, 1, 1], [], []>} : vector<2x32xf32>, vector<32x128xf32>, vector<2x128xf32> -> vector<2x128xf32>
    %52 = arith.addf %50, %51 : vector<2x128xf32>
    %53 = arith.negf %52 : vector<2x128xf32>
    %54 = math.exp %53 : vector<2x128xf32>
    %cst_12 = arith.constant 1.000000e+00 : f32
    %55 = vector.broadcast %cst_12 : f32 to vector<2x128xf32>
    %56 = arith.addf %55, %54 : vector<2x128xf32>
    %57 = arith.divf %55, %56 : vector<2x128xf32>
    %58 = math.tanh %52 : vector<2x128xf32>
    %59 = vector.extract_strided_slice %57 {offsets = [0, 32], sizes = [2, 32], strides = [1, 1]} : vector<2x128xf32> to vector<2x32xf32>
    %60 = arith.mulf %59, %46 : vector<2x32xf32>
    %61 = vector.extract_strided_slice %57 {offsets = [0, 0], sizes = [2, 32], strides = [1, 1]} : vector<2x128xf32> to vector<2x32xf32>
    %62 = vector.extract_strided_slice %58 {offsets = [0, 64], sizes = [2, 32], strides = [1, 1]} : vector<2x128xf32> to vector<2x32xf32>
    %63 = arith.mulf %61, %62 : vector<2x32xf32>
    %64 = arith.addf %60, %63 : vector<2x32xf32>
    %65 = vector.extract_strided_slice %57 {offsets = [0, 96], sizes = [2, 32], strides = [1, 1]} : vector<2x128xf32> to vector<2x32xf32>
    %66 = math.tanh %64 : vector<2x32xf32>
    %67 = arith.mulf %65, %66 : vector<2x32xf32>
    %68 = vector.extract_strided_slice %10 {offsets = [6, 0], sizes = [2, 128], strides = [1, 1]} : vector<16x128xf32> to vector<2x128xf32>
    %cst_13 = arith.constant dense<0.000000e+00> : vector<2x128xf32>
    %69 = tpu.matmul %67, %11, %cst_13 {dimension_numbers = #tpu.dot_dimension_numbers<[1], [0], [0], [1], [0, 0, 1, 1], [], []>} : vector<2x32xf32>, vector<32x128xf32>, vector<2x128xf32> -> vector<2x128xf32>
    %70 = arith.addf %68, %69 : vector<2x128xf32>
    %71 = arith.negf %70 : vector<2x128xf32>
    %72 = math.exp %71 : vector<2x128xf32>
    %cst_14 = arith.constant 1.000000e+00 : f32
    %73 = vector.broadcast %cst_14 : f32 to vector<2x128xf32>
    %74 = arith.addf %73, %72 : vector<2x128xf32>
    %75 = arith.divf %73, %74 : vector<2x128xf32>
    %76 = math.tanh %70 : vector<2x128xf32>
    %77 = vector.extract_strided_slice %75 {offsets = [0, 32], sizes = [2, 32], strides = [1, 1]} : vector<2x128xf32> to vector<2x32xf32>
    %78 = arith.mulf %77, %64 : vector<2x32xf32>
    %79 = vector.extract_strided_slice %75 {offsets = [0, 0], sizes = [2, 32], strides = [1, 1]} : vector<2x128xf32> to vector<2x32xf32>
    %80 = vector.extract_strided_slice %76 {offsets = [0, 64], sizes = [2, 32], strides = [1, 1]} : vector<2x128xf32> to vector<2x32xf32>
    %81 = arith.mulf %79, %80 : vector<2x32xf32>
    %82 = arith.addf %78, %81 : vector<2x32xf32>
    %83 = vector.extract_strided_slice %75 {offsets = [0, 96], sizes = [2, 32], strides = [1, 1]} : vector<2x128xf32> to vector<2x32xf32>
    %84 = math.tanh %82 : vector<2x32xf32>
    %85 = arith.mulf %83, %84 : vector<2x32xf32>
    %86 = vector.extract_strided_slice %10 {offsets = [8, 0], sizes = [2, 128], strides = [1, 1]} : vector<16x128xf32> to vector<2x128xf32>
    %cst_15 = arith.constant dense<0.000000e+00> : vector<2x128xf32>
    %87 = tpu.matmul %85, %11, %cst_15 {dimension_numbers = #tpu.dot_dimension_numbers<[1], [0], [0], [1], [0, 0, 1, 1], [], []>} : vector<2x32xf32>, vector<32x128xf32>, vector<2x128xf32> -> vector<2x128xf32>
    %88 = arith.addf %86, %87 : vector<2x128xf32>
    %89 = arith.negf %88 : vector<2x128xf32>
    %90 = math.exp %89 : vector<2x128xf32>
    %cst_16 = arith.constant 1.000000e+00 : f32
    %91 = vector.broadcast %cst_16 : f32 to vector<2x128xf32>
    %92 = arith.addf %91, %90 : vector<2x128xf32>
    %93 = arith.divf %91, %92 : vector<2x128xf32>
    %94 = math.tanh %88 : vector<2x128xf32>
    %95 = vector.extract_strided_slice %93 {offsets = [0, 32], sizes = [2, 32], strides = [1, 1]} : vector<2x128xf32> to vector<2x32xf32>
    %96 = arith.mulf %95, %82 : vector<2x32xf32>
    %97 = vector.extract_strided_slice %93 {offsets = [0, 0], sizes = [2, 32], strides = [1, 1]} : vector<2x128xf32> to vector<2x32xf32>
    %98 = vector.extract_strided_slice %94 {offsets = [0, 64], sizes = [2, 32], strides = [1, 1]} : vector<2x128xf32> to vector<2x32xf32>
    %99 = arith.mulf %97, %98 : vector<2x32xf32>
    %100 = arith.addf %96, %99 : vector<2x32xf32>
    %101 = vector.extract_strided_slice %93 {offsets = [0, 96], sizes = [2, 32], strides = [1, 1]} : vector<2x128xf32> to vector<2x32xf32>
    %102 = math.tanh %100 : vector<2x32xf32>
    %103 = arith.mulf %101, %102 : vector<2x32xf32>
    %104 = vector.extract_strided_slice %10 {offsets = [10, 0], sizes = [2, 128], strides = [1, 1]} : vector<16x128xf32> to vector<2x128xf32>
    %cst_17 = arith.constant dense<0.000000e+00> : vector<2x128xf32>
    %105 = tpu.matmul %103, %11, %cst_17 {dimension_numbers = #tpu.dot_dimension_numbers<[1], [0], [0], [1], [0, 0, 1, 1], [], []>} : vector<2x32xf32>, vector<32x128xf32>, vector<2x128xf32> -> vector<2x128xf32>
    %106 = arith.addf %104, %105 : vector<2x128xf32>
    %107 = arith.negf %106 : vector<2x128xf32>
    %108 = math.exp %107 : vector<2x128xf32>
    %cst_18 = arith.constant 1.000000e+00 : f32
    %109 = vector.broadcast %cst_18 : f32 to vector<2x128xf32>
    %110 = arith.addf %109, %108 : vector<2x128xf32>
    %111 = arith.divf %109, %110 : vector<2x128xf32>
    %112 = math.tanh %106 : vector<2x128xf32>
    %113 = vector.extract_strided_slice %111 {offsets = [0, 32], sizes = [2, 32], strides = [1, 1]} : vector<2x128xf32> to vector<2x32xf32>
    %114 = arith.mulf %113, %100 : vector<2x32xf32>
    %115 = vector.extract_strided_slice %111 {offsets = [0, 0], sizes = [2, 32], strides = [1, 1]} : vector<2x128xf32> to vector<2x32xf32>
    %116 = vector.extract_strided_slice %112 {offsets = [0, 64], sizes = [2, 32], strides = [1, 1]} : vector<2x128xf32> to vector<2x32xf32>
    %117 = arith.mulf %115, %116 : vector<2x32xf32>
    %118 = arith.addf %114, %117 : vector<2x32xf32>
    %119 = vector.extract_strided_slice %111 {offsets = [0, 96], sizes = [2, 32], strides = [1, 1]} : vector<2x128xf32> to vector<2x32xf32>
    %120 = math.tanh %118 : vector<2x32xf32>
    %121 = arith.mulf %119, %120 : vector<2x32xf32>
    %122 = vector.extract_strided_slice %10 {offsets = [12, 0], sizes = [2, 128], strides = [1, 1]} : vector<16x128xf32> to vector<2x128xf32>
    %cst_19 = arith.constant dense<0.000000e+00> : vector<2x128xf32>
    %123 = tpu.matmul %121, %11, %cst_19 {dimension_numbers = #tpu.dot_dimension_numbers<[1], [0], [0], [1], [0, 0, 1, 1], [], []>} : vector<2x32xf32>, vector<32x128xf32>, vector<2x128xf32> -> vector<2x128xf32>
    %124 = arith.addf %122, %123 : vector<2x128xf32>
    %125 = arith.negf %124 : vector<2x128xf32>
    %126 = math.exp %125 : vector<2x128xf32>
    %cst_20 = arith.constant 1.000000e+00 : f32
    %127 = vector.broadcast %cst_20 : f32 to vector<2x128xf32>
    %128 = arith.addf %127, %126 : vector<2x128xf32>
    %129 = arith.divf %127, %128 : vector<2x128xf32>
    %130 = math.tanh %124 : vector<2x128xf32>
    %131 = vector.extract_strided_slice %129 {offsets = [0, 32], sizes = [2, 32], strides = [1, 1]} : vector<2x128xf32> to vector<2x32xf32>
    %132 = arith.mulf %131, %118 : vector<2x32xf32>
    %133 = vector.extract_strided_slice %129 {offsets = [0, 0], sizes = [2, 32], strides = [1, 1]} : vector<2x128xf32> to vector<2x32xf32>
    %134 = vector.extract_strided_slice %130 {offsets = [0, 64], sizes = [2, 32], strides = [1, 1]} : vector<2x128xf32> to vector<2x32xf32>
    %135 = arith.mulf %133, %134 : vector<2x32xf32>
    %136 = arith.addf %132, %135 : vector<2x32xf32>
    %137 = vector.extract_strided_slice %129 {offsets = [0, 96], sizes = [2, 32], strides = [1, 1]} : vector<2x128xf32> to vector<2x32xf32>
    %138 = math.tanh %136 : vector<2x32xf32>
    %139 = arith.mulf %137, %138 : vector<2x32xf32>
    %140 = vector.extract_strided_slice %10 {offsets = [14, 0], sizes = [2, 128], strides = [1, 1]} : vector<16x128xf32> to vector<2x128xf32>
    %cst_21 = arith.constant dense<0.000000e+00> : vector<2x128xf32>
    %141 = tpu.matmul %139, %11, %cst_21 {dimension_numbers = #tpu.dot_dimension_numbers<[1], [0], [0], [1], [0, 0, 1, 1], [], []>} : vector<2x32xf32>, vector<32x128xf32>, vector<2x128xf32> -> vector<2x128xf32>
    %142 = arith.addf %140, %141 : vector<2x128xf32>
    %143 = arith.negf %142 : vector<2x128xf32>
    %144 = math.exp %143 : vector<2x128xf32>
    %cst_22 = arith.constant 1.000000e+00 : f32
    %145 = vector.broadcast %cst_22 : f32 to vector<2x128xf32>
    %146 = arith.addf %145, %144 : vector<2x128xf32>
    %147 = arith.divf %145, %146 : vector<2x128xf32>
    %148 = math.tanh %142 : vector<2x128xf32>
    %149 = vector.extract_strided_slice %147 {offsets = [0, 32], sizes = [2, 32], strides = [1, 1]} : vector<2x128xf32> to vector<2x32xf32>
    %150 = arith.mulf %149, %136 : vector<2x32xf32>
    %151 = vector.extract_strided_slice %147 {offsets = [0, 0], sizes = [2, 32], strides = [1, 1]} : vector<2x128xf32> to vector<2x32xf32>
    %152 = vector.extract_strided_slice %148 {offsets = [0, 64], sizes = [2, 32], strides = [1, 1]} : vector<2x128xf32> to vector<2x32xf32>
    %153 = arith.mulf %151, %152 : vector<2x32xf32>
    %154 = arith.addf %150, %153 : vector<2x32xf32>
    %155 = vector.extract_strided_slice %147 {offsets = [0, 96], sizes = [2, 32], strides = [1, 1]} : vector<2x128xf32> to vector<2x32xf32>
    %156 = math.tanh %154 : vector<2x32xf32>
    %157 = arith.mulf %155, %156 : vector<2x32xf32>
    %c0_23 = arith.constant 0 : index
    %c0_24 = arith.constant 0 : index
    %158 = vector.load %arg5[%c0_23, %c0_24] : memref<205x32xf32, #tpu.memory_space<vmem>>, vector<64x32xf32>
    %c64 = arith.constant 64 : index
    %c0_25 = arith.constant 0 : index
    %159 = vector.load %arg5[%c64, %c0_25] : memref<205x32xf32, #tpu.memory_space<vmem>>, vector<5x32xf32>
    %c72 = arith.constant 72 : index
    %c0_26 = arith.constant 0 : index
    %160 = vector.load %arg5[%c72, %c0_26] : memref<205x32xf32, #tpu.memory_space<vmem>>, vector<32x32xf32>
    %c104 = arith.constant 104 : index
    %c0_27 = arith.constant 0 : index
    %161 = vector.load %arg5[%c104, %c0_27] : memref<205x32xf32, #tpu.memory_space<vmem>>, vector<32x32xf32>
    %c136 = arith.constant 136 : index
    %c0_28 = arith.constant 0 : index
    %162 = vector.load %arg5[%c136, %c0_28] : memref<205x32xf32, #tpu.memory_space<vmem>>, vector<32x32xf32>
    %c168 = arith.constant 168 : index
    %c0_29 = arith.constant 0 : index
    %163 = vector.load %arg5[%c168, %c0_29] : memref<205x32xf32, #tpu.memory_space<vmem>>, vector<32x32xf32>
    %c200 = arith.constant 200 : index
    %c0_30 = arith.constant 0 : index
    %164 = vector.load %arg5[%c200, %c0_30] : memref<205x32xf32, #tpu.memory_space<vmem>>, vector<1x32xf32>
    %c201 = arith.constant 201 : index
    %c0_31 = arith.constant 0 : index
    %165 = vector.load %arg5[%c201, %c0_31] : memref<205x32xf32, #tpu.memory_space<vmem>>, vector<1x32xf32>
    %c202 = arith.constant 202 : index
    %c0_32 = arith.constant 0 : index
    %166 = vector.load %arg5[%c202, %c0_32] : memref<205x32xf32, #tpu.memory_space<vmem>>, vector<1x32xf32>
    %c203 = arith.constant 203 : index
    %c0_33 = arith.constant 0 : index
    %167 = vector.load %arg5[%c203, %c0_33] : memref<205x32xf32, #tpu.memory_space<vmem>>, vector<1x32xf32>
    %c204 = arith.constant 204 : index
    %c0_34 = arith.constant 0 : index
    %168 = vector.load %arg5[%c204, %c0_34] : memref<205x32xf32, #tpu.memory_space<vmem>>, vector<1x32xf32>
    %c0_35 = arith.constant 0 : index
    %c0_36 = arith.constant 0 : index
    %169 = vector.load %arg2[%c0_35, %c0_36] : memref<16x64xf32, #tpu.memory_space<vmem>>, vector<16x64xf32>
    %cst_37 = arith.constant dense<0.000000e+00> : vector<16x32xf32>
    %170 = tpu.matmul %169, %158, %cst_37 {dimension_numbers = #tpu.dot_dimension_numbers<[1], [0], [0], [1], [0, 0, 1, 1], [], []>} : vector<16x64xf32>, vector<64x32xf32>, vector<16x32xf32> -> vector<16x32xf32>
    %c0_38 = arith.constant 0 : index
    %c0_39 = arith.constant 0 : index
    %171 = vector.load %arg3[%c0_38, %c0_39] : memref<16x5xf32, #tpu.memory_space<vmem>>, vector<16x5xf32>
    %cst_40 = arith.constant dense<0.000000e+00> : vector<16x32xf32>
    %172 = tpu.matmul %171, %159, %cst_40 {dimension_numbers = #tpu.dot_dimension_numbers<[1], [0], [0], [1], [0, 0, 1, 1], [], []>} : vector<16x5xf32>, vector<5x32xf32>, vector<16x32xf32> -> vector<16x32xf32>
    %173 = arith.addf %170, %172 : vector<16x32xf32>
    %174 = vector.broadcast %164 : vector<1x32xf32> to vector<16x32xf32>
    %175 = arith.addf %173, %174 : vector<16x32xf32>
    %176 = vector.shape_cast %175 : vector<16x32xf32> to vector<2x8x32xf32>
    %cst_41 = arith.constant dense<0.000000e+00> : vector<16x32xf32>
    %177 = tpu.matmul %175, %160, %cst_41 {dimension_numbers = #tpu.dot_dimension_numbers<[1], [0], [0], [1], [0, 0, 1, 1], [], []>} : vector<16x32xf32>, vector<32x32xf32>, vector<16x32xf32> -> vector<16x32xf32>
    %cst_42 = arith.constant dense<0.000000e+00> : vector<2x32xf32>
    %178 = tpu.matmul %157, %161, %cst_42 {dimension_numbers = #tpu.dot_dimension_numbers<[1], [0], [0], [1], [0, 0, 1, 1], [], []>} : vector<2x32xf32>, vector<32x32xf32>, vector<2x32xf32> -> vector<2x32xf32>
    %179 = vector.shape_cast %177 : vector<16x32xf32> to vector<2x8x32xf32>
    %180 = vector.shape_cast %178 : vector<2x32xf32> to vector<2x1x32xf32>
    %181 = vector.broadcast %180 : vector<2x1x32xf32> to vector<2x8x32xf32>
    %182 = arith.addf %179, %181 : vector<2x8x32xf32>
    %183 = vector.shape_cast %165 : vector<1x32xf32> to vector<1x1x32xf32>
    %184 = vector.broadcast %183 : vector<1x1x32xf32> to vector<2x8x32xf32>
    %185 = arith.addf %182, %184 : vector<2x8x32xf32>
    %cst_43 = arith.constant 0.000000e+00 : f32
    %186 = vector.broadcast %cst_43 : f32 to vector<2x8x32xf32>
    %187 = arith.maximumf %185, %186 : vector<2x8x32xf32>
    %188 = vector.shape_cast %166 : vector<1x32xf32> to vector<1x1x32xf32>
    %189 = vector.shape_cast %188 : vector<1x1x32xf32> to vector<1x1x32xf32>
    %190 = vector.broadcast %189 : vector<1x1x32xf32> to vector<2x1x32xf32>
    "tpu.trace_start"() <{level = 10 : i32, message = "bqh,bnh->bqn"}> : () -> ()
    %cst_44 = arith.constant dense<0.000000e+00> : vector<2x1x8xf32>
    %191 = tpu.matmul %190, %187, %cst_44 {dimension_numbers = #tpu.dot_dimension_numbers<[2], [2], [1], [1], [0, 0, 0, 1, 1, 1], [0], [0]>} : vector<2x1x32xf32>, vector<2x8x32xf32>, vector<2x1x8xf32> -> vector<2x1x8xf32>
    "tpu.trace_stop"() : () -> ()
    %cst_45 = arith.constant dense<0xFF800000> : vector<2x1xf32>
    %192 = vector.multi_reduction <maximumf>, %191, %cst_45 [2] : vector<2x1x8xf32> to vector<2x1xf32>
    %193 = vector.shape_cast %192 : vector<2x1xf32> to vector<2x1x1xf32>
    %194 = vector.broadcast %193 : vector<2x1x1xf32> to vector<2x1x8xf32>
    %195 = arith.subf %191, %194 : vector<2x1x8xf32>
    %196 = math.exp %195 : vector<2x1x8xf32>
    %cst_46 = arith.constant dense<0.000000e+00> : vector<2x1xf32>
    %197 = vector.multi_reduction <add>, %196, %cst_46 [2] : vector<2x1x8xf32> to vector<2x1xf32>
    %198 = vector.shape_cast %197 : vector<2x1xf32> to vector<2x1x1xf32>
    %199 = vector.broadcast %198 : vector<2x1x1xf32> to vector<2x1x8xf32>
    %200 = arith.divf %196, %199 : vector<2x1x8xf32>
    "tpu.trace_start"() <{level = 10 : i32, message = "bqn,bnh->bqh"}> : () -> ()
    %cst_47 = arith.constant dense<0.000000e+00> : vector<2x1x32xf32>
    %201 = tpu.matmul %200, %176, %cst_47 {dimension_numbers = #tpu.dot_dimension_numbers<[2], [1], [1], [2], [0, 0, 0, 1, 1, 2], [0], [0]>} : vector<2x1x8xf32>, vector<2x8x32xf32>, vector<2x1x32xf32> -> vector<2x1x32xf32>
    "tpu.trace_stop"() : () -> ()
    %202 = vector.shape_cast %201 : vector<2x1x32xf32> to vector<2x32xf32>
    %cst_48 = arith.constant dense<0.000000e+00> : vector<2x32xf32>
    %203 = tpu.matmul %157, %162, %cst_48 {dimension_numbers = #tpu.dot_dimension_numbers<[1], [0], [0], [1], [0, 0, 1, 1], [], []>} : vector<2x32xf32>, vector<32x32xf32>, vector<2x32xf32> -> vector<2x32xf32>
    %204 = vector.broadcast %167 : vector<1x32xf32> to vector<2x32xf32>
    %205 = arith.addf %203, %204 : vector<2x32xf32>
    %cst_49 = arith.constant 0.000000e+00 : f32
    %206 = vector.broadcast %cst_49 : f32 to vector<2x32xf32>
    %207 = arith.maximumf %205, %206 : vector<2x32xf32>
    %cst_50 = arith.constant dense<0.000000e+00> : vector<2x32xf32>
    %208 = tpu.matmul %202, %163, %cst_50 {dimension_numbers = #tpu.dot_dimension_numbers<[1], [0], [0], [1], [0, 0, 1, 1], [], []>} : vector<2x32xf32>, vector<32x32xf32>, vector<2x32xf32> -> vector<2x32xf32>
    %209 = vector.broadcast %168 : vector<1x32xf32> to vector<2x32xf32>
    %210 = arith.addf %208, %209 : vector<2x32xf32>
    %cst_51 = arith.constant 0.000000e+00 : f32
    %211 = vector.broadcast %cst_51 : f32 to vector<2x32xf32>
    %212 = arith.maximumf %210, %211 : vector<2x32xf32>
    %213 = arith.mulf %207, %212 : vector<2x32xf32>
    %c0_52 = arith.constant 0 : index
    %c0_53 = arith.constant 0 : index
    %214 = vector.load %arg6[%c0_52, %c0_53] : memref<105x64xf32, #tpu.memory_space<vmem>>, vector<32x64xf32>
    %cst_54 = arith.constant dense<0.000000e+00> : vector<2x64xf32>
    %215 = tpu.matmul %213, %214, %cst_54 {dimension_numbers = #tpu.dot_dimension_numbers<[1], [0], [0], [1], [0, 0, 1, 1], [], []>} : vector<2x32xf32>, vector<32x64xf32>, vector<2x64xf32> -> vector<2x64xf32>
    %c32 = arith.constant 32 : index
    %c0_55 = arith.constant 0 : index
    %216 = vector.load %arg6[%c32, %c0_55] : memref<105x64xf32, #tpu.memory_space<vmem>>, vector<1x64xf32>
    %217 = vector.broadcast %216 : vector<1x64xf32> to vector<2x64xf32>
    %218 = arith.addf %215, %217 : vector<2x64xf32>
    %cst_56 = arith.constant 0.000000e+00 : f32
    %219 = vector.broadcast %cst_56 : f32 to vector<2x64xf32>
    %220 = arith.maximumf %218, %219 : vector<2x64xf32>
    %c40 = arith.constant 40 : index
    %c0_57 = arith.constant 0 : index
    %221 = vector.load %arg6[%c40, %c0_57] : memref<105x64xf32, #tpu.memory_space<vmem>>, vector<64x64xf32>
    %cst_58 = arith.constant dense<0.000000e+00> : vector<2x64xf32>
    %222 = tpu.matmul %220, %221, %cst_58 {dimension_numbers = #tpu.dot_dimension_numbers<[1], [0], [0], [1], [0, 0, 1, 1], [], []>} : vector<2x64xf32>, vector<64x64xf32>, vector<2x64xf32> -> vector<2x64xf32>
    %c104_59 = arith.constant 104 : index
    %c0_60 = arith.constant 0 : index
    %223 = vector.load %arg6[%c104_59, %c0_60] : memref<105x64xf32, #tpu.memory_space<vmem>>, vector<1x64xf32>
    %224 = vector.broadcast %223 : vector<1x64xf32> to vector<2x64xf32>
    %225 = arith.addf %222, %224 : vector<2x64xf32>
    %226 = vector.extract_strided_slice %225 {offsets = [0, 0], sizes = [2, 10], strides = [1, 1]} : vector<2x64xf32> to vector<2x10xf32>
    %c0_61 = arith.constant 0 : index
    %c0_62 = arith.constant 0 : index
    %227 = vector.load %arg7[%c0_61, %c0_62] : memref<2x10xf32, #tpu.memory_space<vmem>>, vector<2x10xf32>
    tpu.vector_store %arg7[%c0_61, %c0_62], %226 {strides = array<i32>} : memref<2x10xf32, #tpu.memory_space<vmem>>, vector<2x10xf32>,
    return
  }
  func.func @transform_0(%arg0: i32) -> (i32, i32) {
    %c0_i32 = arith.constant 0 : i32
    %c0_i32_0 = arith.constant 0 : i32
    %c0_i32_1 = arith.constant 0 : i32
    return %c0_i32, %c0_i32_0 : i32, i32
  }
  func.func @transform_1(%arg0: i32) -> (i32, i32) {
    %c0_i32 = arith.constant 0 : i32
    %c0_i32_0 = arith.constant 0 : i32
    %c0_i32_1 = arith.constant 0 : i32
    return %c0_i32, %c0_i32_0 : i32, i32
  }
  func.func @transform_2(%arg0: i32) -> (i32, i32) {
    %c0_i32 = arith.constant 0 : i32
    %c0_i32_0 = arith.constant 0 : i32
    %c0_i32_1 = arith.constant 0 : i32
    return %c0_i32, %c0_i32_0 : i32, i32
  }
  func.func @transform_3(%arg0: i32) -> (i32, i32) {
    %c0_i32 = arith.constant 0 : i32
    %c0_i32_0 = arith.constant 0 : i32
    %c0_i32_1 = arith.constant 0 : i32
    return %c0_i32, %c0_i32_0 : i32, i32
  }
  func.func @transform_4(%arg0: i32) -> (i32, i32) {
    %c0_i32 = arith.constant 0 : i32
    %c0_i32_0 = arith.constant 0 : i32
    %c0_i32_1 = arith.constant 0 : i32
    return %c0_i32, %c0_i32_0 : i32, i32
  }
  func.func @transform_5(%arg0: i32) -> (i32, i32) {
    %c0_i32 = arith.constant 0 : i32
    %c0_i32_0 = arith.constant 0 : i32
    %c0_i32_1 = arith.constant 0 : i32
    return %c0_i32, %c0_i32_0 : i32, i32
  }
  func.func @transform_6(%arg0: i32) -> (i32, i32) {
    %c0_i32 = arith.constant 0 : i32
    %c0_i32_0 = arith.constant 0 : i32
    %c0_i32_1 = arith.constant 0 : i32
    return %c0_i32, %c0_i32_0 : i32, i32
  }
}

</mosaic_0001>

<bundles_post_ra>
// kernel: net_forward.1
= control target key start
LH: loop header
LB: loop body
LE: loop exit
PB: predicated region body
PF: predicated region fallthrough
CT: control target
= control target key end

     0   :  { %vm59_vm0 = vcmask 1041408   ;;  %v2530_v2 = vmov 0   ;;  %v2531_v7 = vmov 0.0   ;;  %s2981_s0 = inlined_call_operand.vmem [shape: s32[16,1], index: 0, kind: input, shape index: {}]   ;;  %s2982_s1 = inlined_call_operand.vmem [shape: f32[16,64], index: 1, kind: input, shape index: {}]   ;;  %s2983_s2 = inlined_call_operand.vmem [shape: f32[16,5], index: 2, kind: input, shape index: {}]   ;;  %s2984_s3 = inlined_call_operand.vmem [shape: f32[89,128], index: 3, kind: input, shape index: {}]   ;;  %s2985_s4 = inlined_call_operand.vmem [shape: f32[205,32], index: 4, kind: input, shape index: {}]   ;;  %s2986_s5 = inlined_call_operand.vmem [shape: f32[105,64], index: 5, kind: input, shape index: {}]   ;;  %s2987_s6 = inlined_call_operand.hbm [shape: f32[2,10], index: 6, kind: output, shape index: {}]  }
   0x1   :  { %v24_v0 = vld [vmem:[%s2981_s0] sm:$0xff]  ;;  %v46_v1 = vld [vmem:[%s2984_s3 + $0x30] sm:$0x3]  ;;  %2435 = vset.pattern.permute.xlu0 %v2530_v2  ;;  %v45_v3 = vld [vmem:[%s2984_s3 + $0x28] sm:$0xff]  ;;  %2222 = vmatprep.subr.mxu1 %v2531_v7 }
   0x2   :  { %2205 = vmatprep.subr.msk.mxu0 %vm59_vm0, %v46_v1  ;;  %29 = vperm.xlu0 %2435, %v24_v0   ;;  %v44_v4 = vld [vmem:[%s2984_s3 + $0x20] sm:$0xff]  ;;  %v2587_v5 = vld [vmem:[%s2984_s3 + $0x50] sm:$0xff]  ;;  %v25_v6 = vld [vmem:[%s2981_s0 + $0x8] sm:$0xff] }
   0x3   :  { %2206 = vmatpush3.msk.msra.mxu0 %vm59_vm0, %v46_v1  ;;  %v43_v8 = vld [vmem:[%s2984_s3 + $0x18] sm:$0xff]  ;;  %2223 = vmatpush3.msra.mxu1 %v2587_v5  ;;  %v2600_v9 = vld [vmem:[%s2984_s3 + $0x48] sm:$0xff] }
   0x4   :  { %2207 = vmatprep.subr.mxu0 %v45_v3 }
   0x5   :  { %2208 = vmatpush3.msra.mxu0 %v45_v3 }
   0x6   :  { %11 = vsyncpa [#allocation3], 0  ;;  %2209 = vmatprep.subr.mxu0 %v44_v4  ;;  %2224 = vmatprep.subr.mxu1 %v2531_v7  ;;  %v42_v10 = vld [vmem:[%s2984_s3 + $0x10] sm:$0xff]  ;;  %v2609_v11 = vld [vmem:[%s2984_s3 + $0x40] sm:$0xff]  ;;  %vm2532_vm1 = vmmov 0   ;;  %v26_v15 = vlaneseq  ;;  %vm52_vm2 = vcmask 408576  }
   0x7   :  { %32 = vperm.xlu0 %2435, %v25_v6   ;;  %2210 = vmatpush3.msra.mxu0 %v44_v4  ;;  %v41_v12 = vld [vmem:[%s2984_s3 + $0x8] sm:$0xff]  ;;  %v2619_v13 = vld [vmem:[%s2984_s3 + $0x38] sm:$0xff]  ;;  %v40_v14 = vld [vmem:[%s2984_s3] sm:$0xff]  ;;  %s2533_s24 = smov 64   ;;  %vm142_vm5 = vcmask 261120   ;;  %vm1026_vm6 = vcmask 1044480  }
   0x8   :  { %2211 = vmatprep.subr.mxu0 %v43_v8  ;;  %2225 = vmatpush3.msra.mxu1 %v2600_v9  ;;  %v27_v16 = vand.u32 127, %v26_v15  ;;  %v2057_v23 = vld [vmem:[%s2984_s3 + $0x58] ss:$0 sm:$0xff]  ;;  %s2534_s3 = smov 32   ;;  %vm1019_vm7 = vcmask 39936   ;;  %vm1105_vm8 = vcmask 523264  }
   0x9   :  { %2212 = vmatpush3.msra.mxu0 %v43_v8  ;;  %2226 = vmatprep.subr.mxu1 %v2531_v7  ;;  %vm1542_vm9 = vcmask 57344   ;;  %vm1565_vm10 = vcmask 64512   ;;  %vm1794_vm11 = vcmask 1041409   ;;  %s2536_s0 = smov [#allocation2]   ;;  %vm2039_vm12 = vcmask 74752  }
   0xa   :  { %2213 = vmatprep.subr.mxu0 %v42_v10  ;;  %2227 = vmatpush3.msra.mxu1 %v2609_v11  ;;  %s2047_s13 = sshll.u32 %s2536_s0, 4  ;;  %s2048_s13 = int_to_ptr.vmem [resolvable:$true] %s2047_s13 }
   0xb   :  { %2214 = vmatpush3.msra.mxu0 %v42_v10  ;;  %2228 = vmatprep.subr.mxu1 %v2531_v7  ;;  %p2513_p1 = scmp.lt.s32.totalorder %s2048_s13, %s2048_s13 }
   0xc   :  { %2215 = vmatprep.subr.mxu0 %v41_v12  ;;  %2229 = vmatpush3.msra.mxu1 %v2619_v13 }
   0xd   :  { %2216 = vmatpush3.msra.mxu0 %v41_v12  ;;  %2230 = vmatprep.mubr.msk.f32.mxu1 %vm2532_vm1, %v2531_v7 }
   0xe   :  { %2217 = vmatprep.subr.mxu0 %v40_v14  ;;  %2231 = vmatmul.mubr.f32.vlgmr.msra.gmra.mxu1 %v2531_v7 }
   0xf   :  { %2218 = vmatpush3.msra.mxu0 %v40_v14  ;;  %2233 = vmatprep.subr.mxu1 %v2531_v7 }
  0x10   :  { %2234 = vmatpush3.msra.mxu1 %v2587_v5  ;;  %2241 = vmatprep.mubr.msk.f32.mxu1 %vm2532_vm1, %v2531_v7 }
  0x11   :  { %2235 = vmatprep.subr.mxu1 %v2531_v7  ;;  %2244 = vmatprep.subr.mxu0 %v2531_v7 }
  0x12   :  { %2236 = vmatpush3.msra.mxu1 %v2600_v9 }
  0x13   :  { %2237 = vmatprep.subr.mxu1 %v2531_v7 }
  0x14   :  { %2238 = vmatpush3.msra.mxu1 %v2609_v11 }
  0x15   :  { %2239 = vmatprep.subr.mxu1 %v2531_v7 }
  0x16   :  { %2240 = vmatpush3.msra.mxu1 %v2619_v13 }
  0x17   :  { %2255 = vmatprep.subr.mxu1 %v2531_v7 }
  0x7d   :  { %v30_v17 = vpop.permute.xlu0 %29 }
  0x7e   :  { %vm34_vm3 = vcmp.eq.s32.totalorder %v27_v16, %v30_v17 }
  0x7f   :  { %v2055_v18 = vsel %vm34_vm3, 1.0, %v2531_v7 }
  0x80   :  { %2219 = vmatprep.mubr.msk.f32.mxu0 %vm52_vm2, %v2055_v18 }
  0x82   :  { %v33_v19 = vpop.permute.xlu0 %32 }
  0x83   :  { %vm35_vm4 = vcmp.eq.s32.totalorder %v27_v16, %v33_v19 }
  0x84   :  { %v2056_v20 = vsel %vm35_vm4, 1.0, %v2531_v7 }
  0x85   :  { %2220 = vmatmul.mubr.msk.f32.vlgmr.msra.gmra.mxu0 %vm52_vm2, %v2056_v20 }
  0x86   :  { %2245 = vmatpush3.msra.mxu0 %v2587_v5  ;;  %2252 = vmatprep.mubr.msk.f32.mxu0 %vm2532_vm1, %v2531_v7 }
  0x87   :  { %2246 = vmatprep.subr.mxu0 %v2531_v7 }
  0x88   :  { %2247 = vmatpush3.msra.mxu0 %v2600_v9 }
  0x89   :  { %2248 = vmatprep.subr.mxu0 %v2531_v7 }
  0x8a   :  { %2249 = vmatpush3.msra.mxu0 %v2609_v11 }
  0x8b   :  { %2250 = vmatprep.subr.mxu0 %v2531_v7 }
  0x8c   :  { %2251 = vmatpush3.msra.mxu0 %v2619_v13 }
  0x8d   :  { %2266 = vmatprep.subr.mxu0 %v2531_v7 }
  0xce   :  { %v212_v21 = vpop.f32.mrf.mxu1 }
  0xd0   :  { %v2232_v22 = vpop.f32.mrf.mxu1 }
 0x145   :  { %v2221_v24 = vpop.f32.mrf.mxu0 }
 0x146   :  { %v2658_v25 = vadd.f32 %v2221_v24, %v2057_v23 }
 0x147   :  { %v129_v26 = vpop.f32.mrf.mxu0 }
 0x148   :  { %v2660_v27 = vadd.f32 %v2057_v23, %v129_v26 }
 0x14a   :  { %v216_v28 = vadd.f32 %v212_v21, %v2660_v27 }
 0x14c   :  { %2436 = vtanh.f32 %v216_v28  ;;  %v2061_v30 = vmul.f32 -1.442695, %v216_v28 }
 0x14e   :  { %2438 = vpow2.f32 %v2061_v30 }
 0x159   :  { %v2437_v29 = vpop.eup %2436 }
 0x15a   :  { %226 = vrot.lane.b32.xlu1 %v2437_v29, %s2533_s24 }
 0x15b   :  { %v2439_v31 = vpop.eup %2438 }
 0x15c   :  { %v220_v32 = vadd.f32 1.0, %v2439_v31 }
 0x15e   :  { %2440 = vrcp.f32 %v220_v32 }
 0x16b   :  { %v2441_v33 = vpop.eup %2440 }
 0x16c   :  { %v224_v36 = vmul.f32 0.0, %v2441_v33 }
 0x1cc   :  { %v227_v34 = vpop.permute.xlu1 %226 }
 0x1cd   :  { %v229_v35 = vmul.f32 %v2441_v33, %v227_v34 }
 0x1cf   :  { %231 = vrot.lane.b32.xlu1 %v229_v35, %s2534_s3 }
 0x241   :  { %v232_v37 = vpop.permute.xlu1 %231 }
 0x242   :  { %v234_v38 = vadd.f32 %v232_v37, %v224_v36 }
 0x244   :  { %2442 = vtanh.f32 %v234_v38  ;;  %v328_v54 = vrot.slane %v234_v38, 6 }
 0x251   :  { %v2443_v39 = vpop.eup %2442 }
 0x252   :  { %237 = vrot.lane.b32.xlu0 %v2443_v39, %s2533_s24 }
 0x2c4   :  { %v238_v40 = vpop.permute.xlu0 %237 }
 0x2c5   :  { %v240_v41 = vmul.f32 %v2441_v33, %v238_v40 }
 0x2c7   :  { %242 = vrot.lane.b32.xlu1 %v240_v41, %s2534_s3 }
 0x339   :  { %v243_v42 = vpop.permute.xlu1 %242 }
 0x33a   :  { %2242 = vmatmul.mubr.msk.f32.vlgmr.msra.gmra.mxu1 %vm142_vm5, %v243_v42 }
 0x33b   :  { %2256 = vmatpush3.msra.mxu1 %v2587_v5  ;;  %2263 = vmatprep.mubr.msk.f32.mxu1 %vm2532_vm1, %v2531_v7 }
 0x33c   :  { %2257 = vmatprep.subr.mxu1 %v2531_v7 }
 0x33d   :  { %2258 = vmatpush3.msra.mxu1 %v2600_v9 }
 0x33e   :  { %2259 = vmatprep.subr.mxu1 %v2531_v7 }
 0x33f   :  { %2260 = vmatpush3.msra.mxu1 %v2609_v11 }
 0x340   :  { %2261 = vmatprep.subr.mxu1 %v2531_v7 }
 0x341   :  { %2262 = vmatpush3.msra.mxu1 %v2619_v13 }
 0x342   :  { %2277 = vmatprep.subr.mxu1 %v2531_v7 }
 0x3fa   :  { %v312_v43 = vpop.f32.mrf.mxu1 }
 0x3fb   :  { %v317_v44 = vrot.slane %v312_v43, 6 }
 0x3fc   :  { %v2243_v45 = vpop.f32.mrf.mxu1 }
 0x3fd   :  { %v319_v46 = vadd.f32 %v317_v44, %v2660_v27 }
 0x3ff   :  { %2444 = vtanh.f32 %v319_v46  ;;  %v2063_v48 = vmul.f32 -1.442695, %v319_v46 }
 0x401   :  { %2446 = vpow2.f32 %v2063_v48 }
 0x40c   :  { %v2445_v47 = vpop.eup %2444 }
 0x40d   :  { %332 = vrot.lane.b32.xlu0 %v2445_v47, %s2533_s24 }
 0x40e   :  { %v2447_v49 = vpop.eup %2446 }
 0x40f   :  { %v323_v50 = vadd.f32 1.0, %v2447_v49 }
 0x411   :  { %2448 = vrcp.f32 %v323_v50 }
 0x41e   :  { %v2449_v51 = vpop.eup %2448 }
 0x41f   :  { %v330_v55 = vmul.f32 %v2449_v51, %v328_v54 }
 0x47f   :  { %v333_v52 = vpop.permute.xlu0 %332 }
 0x480   :  { %v335_v53 = vmul.f32 %v2449_v51, %v333_v52 }
 0x482   :  { %337 = vrot.lane.b32.xlu1 %v335_v53, %s2534_s3 }
 0x4f4   :  { %v338_v56 = vpop.permute.xlu1 %337 }
 0x4f5   :  { %v340_v57 = vadd.f32 %v338_v56, %v330_v55 }
 0x4f7   :  { %2450 = vtanh.f32 %v340_v57  ;;  %v435_v16 = vrot.slane %v340_v57, 6 }
 0x504   :  { %v2451_v58 = vpop.eup %2450 }
 0x505   :  { %343 = vrot.lane.b32.xlu0 %v2451_v58, %s2533_s24 }
 0x577   :  { %v344_v59 = vpop.permute.xlu0 %343 }
 0x578   :  { %v346_v60 = vmul.f32 %v2449_v51, %v344_v59 }
 0x57a   :  { %v348_v61 = vrot.slane %v346_v60, 2 }
 0x57c   :  { %349 = vrot.lane.b32.xlu1 %v348_v61, %s2534_s3 }
 0x5ee   :  { %v350_v62 = vpop.permute.xlu1 %349 }
 0x5ef   :  { %2253 = vmatmul.mubr.msk.f32.vlgmr.msra.gmra.mxu0 %vm142_vm5, %v350_v62 }
 0x5f0   :  { %2267 = vmatpush3.msra.mxu0 %v2587_v5  ;;  %2274 = vmatprep.mubr.msk.f32.mxu0 %vm2532_vm1, %v2531_v7 }
 0x5f1   :  { %2268 = vmatprep.subr.mxu0 %v2531_v7 }
 0x5f2   :  { %2269 = vmatpush3.msra.mxu0 %v2600_v9 }
 0x5f3   :  { %2270 = vmatprep.subr.mxu0 %v2531_v7 }
 0x5f4   :  { %2271 = vmatpush3.msra.mxu0 %v2609_v11 }
 0x5f5   :  { %2272 = vmatprep.subr.mxu0 %v2531_v7 }
 0x5f6   :  { %2273 = vmatpush3.msra.mxu0 %v2619_v13 }
 0x5f7   :  { %2288 = vmatprep.subr.mxu0 %v2531_v7 }
 0x6af   :  { %v419_v63 = vpop.f32.mrf.mxu0 }
 0x6b0   :  { %v424_v0 = vrot.slane %v419_v63, 4 }
 0x6b1   :  { %v2254_v1 = vpop.f32.mrf.mxu0 }
 0x6b2   :  { %v426_v2 = vadd.f32 %v424_v0, %v2660_v27 }
 0x6b4   :  { %2452 = vtanh.f32 %v426_v2  ;;  %v2065_v4 = vmul.f32 -1.442695, %v426_v2 }
 0x6b6   :  { %2454 = vpow2.f32 %v2065_v4 }
 0x6c1   :  { %v2453_v3 = vpop.eup %2452 }
 0x6c2   :  { %439 = vrot.lane.b32.xlu0 %v2453_v3, %s2533_s24 }
 0x6c3   :  { %v2455_v6 = vpop.eup %2454 }
 0x6c4   :  { %v430_v8 = vadd.f32 1.0, %v2455_v6 }
 0x6c6   :  { %2456 = vrcp.f32 %v430_v8 }
 0x6d3   :  { %v2457_v10 = vpop.eup %2456 }
 0x6d4   :  { %v437_v17 = vmul.f32 %v2457_v10, %v435_v16 }
 0x734   :  { %v440_v12 = vpop.permute.xlu0 %439 }
 0x735   :  { %v442_v14 = vmul.f32 %v2457_v10, %v440_v12 }
 0x737   :  { %444 = vrot.lane.b32.xlu1 %v442_v14, %s2534_s3 }
 0x7a9   :  { %v445_v18 = vpop.permute.xlu1 %444 }
 0x7aa   :  { %v447_v19 = vadd.f32 %v445_v18, %v437_v17 }
 0x7ac   :  { %2458 = vtanh.f32 %v447_v19  ;;  %v542_v38 = vrot.slane %v447_v19, 6 }
 0x7b9   :  { %v2459_v20 = vpop.eup %2458 }
 0x7ba   :  { %450 = vrot.lane.b32.xlu0 %v2459_v20, %s2533_s24 }
 0x82c   :  { %v451_v21 = vpop.permute.xlu0 %450 }
 0x82d   :  { %v453_v22 = vmul.f32 %v2457_v10, %v451_v21 }
 0x82f   :  { %v455_v23 = vrot.slane %v453_v22, 4 }
 0x831   :  { %456 = vrot.lane.b32.xlu1 %v455_v23, %s2534_s3 }
 0x8a3   :  { %v457_v24 = vpop.permute.xlu1 %456 }
 0x8a4   :  { %2264 = vmatmul.mubr.msk.f32.vlgmr.msra.gmra.mxu1 %vm142_vm5, %v457_v24 }
 0x8a5   :  { %2278 = vmatpush3.msra.mxu1 %v2587_v5  ;;  %2285 = vmatprep.mubr.msk.f32.mxu1 %vm2532_vm1, %v2531_v7 }
 0x8a6   :  { %2279 = vmatprep.subr.mxu1 %v2531_v7 }
 0x8a7   :  { %2280 = vmatpush3.msra.mxu1 %v2600_v9 }
 0x8a8   :  { %2281 = vmatprep.subr.mxu1 %v2531_v7 }
 0x8a9   :  { %2282 = vmatpush3.msra.mxu1 %v2609_v11 }
 0x8aa   :  { %2283 = vmatprep.subr.mxu1 %v2531_v7 }
 0x8ab   :  { %2284 = vmatpush3.msra.mxu1 %v2619_v13 }
 0x8ac   :  { %2299 = vmatprep.subr.mxu1 %v2531_v7 }
 0x964   :  { %v526_v26 = vpop.f32.mrf.mxu1 }
 0x965   :  { %v531_v28 = vrot.slane %v526_v26, 2 }
 0x966   :  { %v2265_v29 = vpop.f32.mrf.mxu1 }
 0x967   :  { %v533_v30 = vadd.f32 %v531_v28, %v2660_v27 }
 0x969   :  { %2460 = vtanh.f32 %v533_v30  ;;  %v2067_v32 = vmul.f32 -1.442695, %v533_v30 }
 0x96b   :  { %2462 = vpow2.f32 %v2067_v32 }
 0x976   :  { %v2461_v31 = vpop.eup %2460 }
 0x977   :  { %546 = vrot.lane.b32.xlu0 %v2461_v31, %s2533_s24 }
 0x978   :  { %v2463_v33 = vpop.eup %2462 }
 0x979   :  { %v537_v34 = vadd.f32 1.0, %v2463_v33 }
 0x97b   :  { %2464 = vrcp.f32 %v537_v34 }
 0x988   :  { %v2465_v35 = vpop.eup %2464 }
 0x989   :  { %v544_v39 = vmul.f32 %v2465_v35, %v542_v38 }
 0x9e9   :  { %v547_v36 = vpop.permute.xlu0 %546 }
 0x9ea   :  { %v549_v37 = vmul.f32 %v2465_v35, %v547_v36 }
 0x9ec   :  { %551 = vrot.lane.b32.xlu1 %v549_v37, %s2534_s3 }
 0xa5e   :  { %v552_v40 = vpop.permute.xlu1 %551 }
 0xa5f   :  { %v554_v41 = vadd.f32 %v552_v40, %v544_v39 }
 0xa61   :  { %2466 = vtanh.f32 %v554_v41  ;;  %v646_v56 = vrot.slane %v554_v41, 6 }
 0xa6e   :  { %v2467_v27 = vpop.eup %2466 }
 0xa6f   :  { %557 = vrot.lane.b32.xlu0 %v2467_v27, %s2533_s24 }
 0xae1   :  { %v558_v42 = vpop.permute.xlu0 %557 }
 0xae2   :  { %v560_v43 = vmul.f32 %v2465_v35, %v558_v42 }
 0xae4   :  { %v562_v44 = vrot.slane %v560_v43, 6 }
 0xae6   :  { %563 = vrot.lane.b32.xlu1 %v562_v44, %s2534_s3 }
 0xb58   :  { %v564_v45 = vpop.permute.xlu1 %563 }
 0xb59   :  { %2275 = vmatmul.mubr.msk.f32.vlgmr.msra.gmra.mxu0 %vm142_vm5, %v564_v45 }
 0xb5a   :  { %2289 = vmatpush3.msra.mxu0 %v2587_v5  ;;  %2296 = vmatprep.mubr.msk.f32.mxu0 %vm2532_vm1, %v2531_v7 }
 0xb5b   :  { %2290 = vmatprep.subr.mxu0 %v2531_v7 }
 0xb5c   :  { %2291 = vmatpush3.msra.mxu0 %v2600_v9 }
 0xb5d   :  { %2292 = vmatprep.subr.mxu0 %v2531_v7 }
 0xb5e   :  { %2293 = vmatpush3.msra.mxu0 %v2609_v11 }
 0xb5f   :  { %2294 = vmatprep.subr.mxu0 %v2531_v7 }
 0xb60   :  { %2295 = vmatpush3.msra.mxu0 %v2619_v13 }
 0xc19   :  { %v633_v46 = vpop.f32.mrf.mxu0 }
 0xc1a   :  { %v637_v47 = vadd.f32 %v633_v46, %v2658_v25 }
 0xc1b   :  { %v2276_v48 = vpop.f32.mrf.mxu0 }
 0xc1c   :  { %2468 = vtanh.f32 %v637_v47  ;;  %v2069_v50 = vmul.f32 -1.442695, %v637_v47 }
 0xc1e   :  { %2470 = vpow2.f32 %v2069_v50 }
 0xc29   :  { %v2469_v49 = vpop.eup %2468 }
 0xc2a   :  { %650 = vrot.lane.b32.xlu0 %v2469_v49, %s2533_s24 }
 0xc2b   :  { %v2471_v51 = vpop.eup %2470 }
 0xc2c   :  { %v641_v52 = vadd.f32 1.0, %v2471_v51  ;;  %v993_v51 = vld [vmem:[%s2985_s4 + $0x40] sm:$0x1f] }
 0xc2e   :  { %2472 = vrcp.f32 %v641_v52  ;;  %v1017_v52 = vld [vmem:[%s2983_s2] sm:$0xff] }
 0xc3b   :  { %v2473_v53 = vpop.eup %2472 }
 0xc3c   :  { %v648_v57 = vmul.f32 %v2473_v53, %v646_v56  ;;  %v989_v56 = vld [vmem:[%s2985_s4 + $0x20] sm:$0xff] }
 0xc9c   :  { %v651_v54 = vpop.permute.xlu0 %650 }
 0xc9d   :  { %v653_v55 = vmul.f32 %v2473_v53, %v651_v54  ;;  %v991_v54 = vld [vmem:[%s2985_s4 + $0x30] sm:$0xff] }
 0xc9f   :  { %655 = vrot.lane.b32.xlu1 %v653_v55, %s2534_s3  ;;  %v990_v55 = vld [vmem:[%s2985_s4 + $0x28] sm:$0xff] }
 0xd11   :  { %v656_v58 = vpop.permute.xlu1 %655 }
 0xd12   :  { %v658_v59 = vadd.f32 %v656_v58, %v648_v57 }
 0xd14   :  { %2474 = vtanh.f32 %v658_v59 }
 0xd21   :  { %v2475_v60 = vpop.eup %2474 }
 0xd22   :  { %661 = vrot.lane.b32.xlu0 %v2475_v60, %s2533_s24 }
 0xd94   :  { %v662_v61 = vpop.permute.xlu0 %661 }
 0xd95   :  { %v664_v62 = vmul.f32 %v2473_v53, %v662_v61  ;;  %v1018_v53 = vld [vmem:[%s2983_s2 + $0x8] sm:$0xff]  ;;  %v987_v61 = vld [vmem:[%s2985_s4 + $0x10] sm:$0xff]  ;;  %s2508_s2 = scalar_lea.vmem %s2048_s13, 32 }
 0xd96   :  { %p2509_p0 = scmp.ne.s32.totalorder %s2048_s13, %s2508_s2  ;;  %p2514_p2 = scmp.lt.s32.totalorder %s2508_s2, %s2508_s2 }
 0xd97   :  { %666 = vrot.lane.b32.xlu1 %v664_v62, %s2534_s3  ;;  %v986_v62 = vld [vmem:[%s2985_s4 + $0x8] sm:$0xff] }
 0xd98   :  { %p2515_p3 = por %p2514_p2, %p2513_p1 }
 0xd9a   :  { %p2516_p4 = pnand %p2515_p3, %p2509_p0 }
 0xe09   :  { %v667_v63 = vpop.permute.xlu1 %666 }
 0xe0a   :  { %2286 = vmatmul.mubr.msk.f32.vlgmr.msra.gmra.mxu1 %vm142_vm5, %v667_v63  ;;  %v1015_v63 = vld [vmem:[%s2982_s1] sm:$0xff] }
 0xe0b   :  { %2300 = vmatpush3.msra.mxu1 %v2587_v5  ;;  %2307 = vmatprep.mubr.msk.f32.mxu1 %vm2532_vm1, %v2531_v7 }
 0xe0c   :  { %2301 = vmatprep.subr.mxu1 %v2531_v7 }
 0xe0d   :  { %2302 = vmatpush3.msra.mxu1 %v2600_v9 }
 0xe0e   :  { %2303 = vmatprep.subr.mxu1 %v2531_v7 }
 0xe0f   :  { %2304 = vmatpush3.msra.mxu1 %v2609_v11 }
 0xe10   :  { %2305 = vmatprep.subr.mxu1 %v2531_v7 }
 0xe11   :  { %2306 = vmatpush3.msra.mxu1 %v2619_v13  ;;  %v752_v13 = vrot.slane %v658_v59, 6  ;;  %v988_v59 = vld [vmem:[%s2985_s4 + $0x18] sm:$0xff] }
 0xe12   :  { %2310 = vmatprep.subr.msk.mxu1 %vm1026_vm6, %v993_v51 }
 0xeca   :  { %v736_v0 = vpop.f32.mrf.mxu1 }
 0xecb   :  { %v741_v1 = vrot.slane %v736_v0, 6  ;;  %v985_v0 = vld [vmem:[%s2985_s4] sm:$0xff] }
 0xecc   :  { %v2287_v2 = vpop.f32.mrf.mxu1 }
 0xecd   :  { %v743_v5 = vadd.f32 %v741_v1, %v2658_v25  ;;  %v1016_v1 = vld [vmem:[%s2982_s1 + $0x8] sm:$0xff] }
 0xecf   :  { %2476 = vtanh.f32 %v743_v5  ;;  %v2071_v4 = vmul.f32 -1.442695, %v743_v5 }
 0xed1   :  { %2478 = vpow2.f32 %v2071_v4 }
 0xedc   :  { %v2477_v3 = vpop.eup %2476 }
 0xedd   :  { %756 = vrot.lane.b32.xlu0 %v2477_v3, %s2533_s24 }
 0xede   :  { %v2479_v9 = vpop.eup %2478 }
 0xedf   :  { %v747_v6 = vadd.f32 1.0, %v2479_v9  ;;  %v997_v9 = vld [vmem:[%s2985_s4 + $0x60] sm:$0xff] }
 0xee0   :  { %2334 = vmatprep.subr.mxu0 %v997_v9 }
 0xee1   :  { %2480 = vrcp.f32 %v747_v6  ;;  %v996_v6 = vld [vmem:[%s2985_s4 + $0x58] sm:$0xff] }
 0xeee   :  { %v2481_v8 = vpop.eup %2480 }
 0xeef   :  { %v754_v12 = vmul.f32 %v2481_v8, %v752_v13 }
 0xf4f   :  { %v757_v11 = vpop.permute.xlu0 %756 }
 0xf50   :  { %v759_v10 = vmul.f32 %v2481_v8, %v757_v11  ;;  %v994_v11 = vld [vmem:[%s2985_s4 + $0x48] sm:$0xff] }
 0xf52   :  { %761 = vrot.lane.b32.xlu1 %v759_v10, %s2534_s3 }
 0xfc4   :  { %v762_v14 = vpop.permute.xlu1 %761 }
 0xfc5   :  { %v764_v16 = vadd.f32 %v762_v14, %v754_v12 }
 0xfc7   :  { %2482 = vtanh.f32 %v764_v16  ;;  %v859_v35 = vrot.slane %v764_v16, 6  ;;  %v2081_v16 = vld [vmem:[%s2985_s4 + $0xc8] ss:$0 sm:$0xff] }
 0xfd4   :  { %v2483_v17 = vpop.eup %2482 }
 0xfd5   :  { %767 = vrot.lane.b32.xlu0 %v2483_v17, %s2533_s24 }
0x1047   :  { %v768_v18 = vpop.permute.xlu0 %767 }
0x1048   :  { %v770_v19 = vmul.f32 %v2481_v8, %v768_v18  ;;  %v995_v8 = vld [vmem:[%s2985_s4 + $0x50] sm:$0xff] }
0x104a   :  { %v772_v20 = vrot.slane %v770_v19, 2 }
0x104c   :  { %773 = vrot.lane.b32.xlu1 %v772_v20, %s2534_s3 }
0x10be   :  { %v774_v21 = vpop.permute.xlu1 %773 }
0x10bf   :  { %2297 = vmatmul.mubr.msk.f32.vlgmr.msra.gmra.mxu0 %vm142_vm5, %v774_v21 }
0x10c0   :  { %2335 = vmatpush3.msra.mxu0 %v997_v9 }
0x10c1   :  { %2336 = vmatprep.subr.mxu0 %v996_v6 }
0x10c2   :  { %2337 = vmatpush3.msra.mxu0 %v996_v6 }
0x10c3   :  { %2338 = vmatprep.subr.mxu0 %v995_v8 }
0x10c4   :  { %2339 = vmatpush3.msra.mxu0 %v995_v8 }
0x10c5   :  { %2340 = vmatprep.subr.mxu0 %v994_v11 }
0x10c6   :  { %2341 = vmatpush3.msra.mxu0 %v994_v11  ;;  %v1009_v11 = vld [vmem:[%s2985_s4 + $0xc0] sm:$0xff] }
0x10c7   :  { %2345 = vmatprep.subr.mxu0 %v2531_v7 }
0x117f   :  { %v843_v22 = vpop.f32.mrf.mxu0 }
0x1180   :  { %v848_v23 = vrot.slane %v843_v22, 4  ;;  %v1001_v22 = vld [vmem:[%s2985_s4 + $0x80] sm:$0xff] }
0x1181   :  { %v2298_v24 = vpop.f32.mrf.mxu0 }
0x1182   :  { %v850_v26 = vadd.f32 %v848_v23, %v2658_v25  ;;  %v1000_v23 = vld [vmem:[%s2985_s4 + $0x78] sm:$0xff]  ;;  %v999_v24 = vld [vmem:[%s2985_s4 + $0x70] sm:$0xff] }
0x1184   :  { %2484 = vtanh.f32 %v850_v26  ;;  %v2073_v29 = vmul.f32 -1.442695, %v850_v26  ;;  %v998_v26 = vld [vmem:[%s2985_s4 + $0x68] sm:$0xff] }
0x1186   :  { %2486 = vpow2.f32 %v2073_v29 }
0x1191   :  { %v2485_v28 = vpop.eup %2484 }
0x1192   :  { %863 = vrot.lane.b32.xlu0 %v2485_v28, %s2533_s24 }
0x1193   :  { %v2487_v30 = vpop.eup %2486 }
0x1194   :  { %v854_v31 = vadd.f32 1.0, %v2487_v30 }
0x1196   :  { %2488 = vrcp.f32 %v854_v31 }
0x11a3   :  { %v2489_v32 = vpop.eup %2488 }
0x11a4   :  { %v861_v36 = vmul.f32 %v2489_v32, %v859_v35 }
0x1204   :  { %v864_v33 = vpop.permute.xlu0 %863 }
0x1205   :  { %v866_v34 = vmul.f32 %v2489_v32, %v864_v33 }
0x1207   :  { %868 = vrot.lane.b32.xlu1 %v866_v34, %s2534_s3  ;;  %v1355_v34 = vshrl.u32 %v26_v15, 7 }
0x1279   :  { %v869_v37 = vpop.permute.xlu1 %868 }
0x127a   :  { %v2749_v38 = vadd.f32 %v869_v37, %v861_v36 }
0x127c   :  { %2490 = vtanh.f32 %v2749_v38  ;;  %v966_v2 = vrot.slane %v2749_v38, 6 }
0x1289   :  { %v2491_v39 = vpop.eup %2490 }
0x128a   :  { %874 = vrot.lane.b32.xlu0 %v2491_v39, %s2533_s24 }
0x12fc   :  { %v875_v40 = vpop.permute.xlu0 %874 }
0x12fd   :  { %v877_v41 = vmul.f32 %v2489_v32, %v875_v40  ;;  %v2535_v32 = vmov 1966171168  }
0x12fe   :  { %v1352_v33 = vunpack.c.l.s4 %v2535_v32  ;;  %v1872_v32 = vld [vmem:[%s2986_s5 + $0x10] sm:$0xff] }
0x12ff   :  { %v879_v27 = vrot.slane %v877_v41, 4  ;;  %v1375_v41 = vsub.s32 0, %v1355_v34 }
0x1300   :  { %v1353_v35 = vunpack.c.0.s8 %v1352_v33  ;;  %v1871_v33 = vld [vmem:[%s2986_s5 + $0x8] sm:$0xff] }
0x1301   :  { %880 = vrot.lane.b32.xlu1 %v879_v27, %s2534_s3 }
0x1302   :  { %v1356_v37 = vsub.s32 %v1353_v35, %v1355_v34  ;;  %v1870_v34 = vld [vmem:[%s2986_s5] sm:$0xff] }
0x1303   :  { %v1960_v35 = vld [vmem:[%s2986_s5 + $0x60] sm:$0xff] }
0x1373   :  { %v881_v42 = vpop.permute.xlu1 %880 }
0x1374   :  { %2308 = vmatmul.mubr.msk.f32.vlgmr.msra.gmra.mxu1 %vm142_vm5, %v881_v42 }
0x1375   :  { %2312 = vmatprep.mubr.msk.f32.mxu1 %vm1019_vm7, %v1017_v52  ;;  %2311 = vmatpush3.msk.msra.mxu1 %vm1026_vm6, %v993_v51 }
0x1378   :  { %2313 = vmatmul.mubr.msk.f32.vlgmr.msra.gmra.mxu1 %vm1019_vm7, %v1018_v53 }
0x1379   :  { %2331 = vmatprep.mubr.msk.f32.mxu1 %vm1105_vm8, %v1015_v63 }
0x1434   :  { %v950_v43 = vpop.f32.mrf.mxu1 }
0x1435   :  { %v955_v44 = vrot.slane %v950_v43, 2 }
0x1436   :  { %v2309_v45 = vpop.f32.mrf.mxu1 }
0x1437   :  { %v957_v46 = vadd.f32 %v955_v44, %v2658_v25  ;;  %v992_v25 = vld [vmem:[%s2985_s4 + $0x38] sm:$0xff] }
0x1438   :  { %2315 = vmatprep.subr.mxu1 %v992_v25  ;;  %v2314_v13 = vpop.f32.mrf.mxu1 }
0x1439   :  { %2492 = vtanh.f32 %v957_v46  ;;  %v2075_v48 = vmul.f32 -1.442695, %v957_v46  ;;  %2316 = vmatpush3.msra.mxu1 %v992_v25  ;;  %v2085_v46 = vld [vmem:[%s2985_s4 + $0xc9] ss:$0 sm:$0xff]  ;;  %v1012_v25 = vld [vmem:[%s2985_s4 + $0xca] sm:$0x1] }
0x143a   :  { %2317 = vmatprep.subr.mxu1 %v991_v54  ;;  %v1096_v12 = vpop.f32.mrf.mxu1 }
0x143b   :  { %2494 = vpow2.f32 %v2075_v48  ;;  %2318 = vmatpush3.msra.mxu1 %v991_v54 }
0x143c   :  { %2319 = vmatprep.subr.mxu1 %v990_v55 }
0x143d   :  { %2320 = vmatpush3.msra.mxu1 %v990_v55 }
0x143e   :  { %2321 = vmatprep.subr.mxu1 %v989_v56 }
0x143f   :  { %2322 = vmatpush3.msra.mxu1 %v989_v56 }
0x1440   :  { %2323 = vmatprep.subr.mxu1 %v988_v59 }
0x1441   :  { %2324 = vmatpush3.msra.mxu1 %v988_v59 }
0x1442   :  { %2325 = vmatprep.subr.mxu1 %v987_v61 }
0x1443   :  { %2326 = vmatpush3.msra.mxu1 %v987_v61 }
0x1444   :  { %2327 = vmatprep.subr.mxu1 %v986_v62 }
0x1445   :  { %2328 = vmatpush3.msra.mxu1 %v986_v62 }
0x1446   :  { %v2493_v47 = vpop.eup %2492  ;;  %2329 = vmatprep.subr.mxu1 %v985_v0 }
0x1447   :  { %970 = vrot.lane.b32.xlu0 %v2493_v47, %s2533_s24  ;;  %2330 = vmatpush3.msra.mxu1 %v985_v0 }
0x1448   :  { %v2495_v49 = vpop.eup %2494  ;;  %2332 = vmatmul.mubr.msk.f32.vlgmr.msra.gmra.mxu1 %vm1105_vm8, %v1016_v1  ;;  %2356 = vmatprep.subr.mxu1 %v2531_v7 }
0x1449   :  { %v961_v50 = vadd.f32 1.0, %v2495_v49  ;;  %2358 = vmatprep.mubr.msk.f32.mxu1 %vm2532_vm1, %v2531_v7 }
0x144b   :  { %2496 = vrcp.f32 %v961_v50 }
0x1458   :  { %v2778_v57 = vpop.eup %2496 }
0x1459   :  { %v968_v5 = vmul.f32 %v2778_v57, %v966_v2 }
0x14b9   :  { %v971_v58 = vpop.permute.xlu0 %970 }
0x14ba   :  { %v973_v60 = vmul.f32 %v2778_v57, %v971_v58 }
0x14bc   :  { %975 = vrot.lane.b32.xlu1 %v973_v60, %s2534_s3 }
0x1508   :  { %v2333_v14 = vpop.f32.mrf.mxu1 }
0x1509   :  { %v1184_v17 = vadd.f32 %v2333_v14, %v2314_v13  ;;  %v1004_v14 = vld [vmem:[%s2985_s4 + $0x98] sm:$0xff] }
0x150a   :  { %v1178_v18 = vpop.f32.mrf.mxu1 }
0x150b   :  { %v1179_v19 = vadd.f32 %v1178_v18, %v1096_v12  ;;  %v1192_v20 = vadd.f32 %v2081_v16, %v1184_v17  ;;  %v1005_v12 = vld [vmem:[%s2985_s4 + $0xa0] sm:$0xff]  ;;  %v1002_v17 = vld [vmem:[%s2985_s4 + $0x88] sm:$0xff]  ;;  %v1008_v18 = vld [vmem:[%s2985_s4 + $0xb8] sm:$0xff] }
0x150d   :  { %v1191_v21 = vadd.f32 %v2081_v16, %v1179_v19  ;;  %v1003_v16 = vld [vmem:[%s2985_s4 + $0x90] sm:$0xff] }
0x150e   :  { %v1007_v19 = vld [vmem:[%s2985_s4 + $0xb0] sm:$0xff] }
0x150f   :  { %2342 = vmatprep.mubr.msk.f32.mxu0 %vm142_vm5, %v1191_v21 }
0x1510   :  { %2343 = vmatmul.mubr.msk.f32.vlgmr.msra.gmra.mxu0 %vm142_vm5, %v1192_v20 }
0x1511   :  { %2346 = vmatpush3.msra.mxu0 %v1001_v22  ;;  %2353 = vmatprep.mubr.msk.f32.mxu0 %vm2532_vm1, %v2531_v7 }
0x1512   :  { %2347 = vmatprep.subr.mxu0 %v2531_v7 }
0x1513   :  { %2348 = vmatpush3.msra.mxu0 %v1000_v23 }
0x1514   :  { %2349 = vmatprep.subr.mxu0 %v2531_v7 }
0x1515   :  { %2350 = vmatpush3.msra.mxu0 %v999_v24 }
0x1516   :  { %2351 = vmatprep.subr.mxu0 %v2531_v7 }
0x1517   :  { %2352 = vmatpush3.msra.mxu0 %v998_v26 }
0x1518   :  { %2361 = vmatprep.subr.mxu0 %v2531_v7 }
0x152e   :  { %v976_v3 = vpop.permute.xlu1 %975 }
0x152f   :  { %v978_v4 = vadd.f32 %v976_v3, %v968_v5 }
0x1531   :  { %2498 = vtanh.f32 %v978_v4 }
0x153e   :  { %v2499_v10 = vpop.eup %2498 }
0x153f   :  { %981 = vrot.lane.b32.xlu0 %v2499_v10, %s2533_s24 }
0x15b1   :  { %v982_v28 = vpop.permute.xlu0 %981 }
0x15b2   :  { %v984_v29 = vmul.f32 %v2778_v57, %v982_v28 }
0x15b4   :  { %v1275_v30 = vrot.slane %v984_v29, 6 }
0x15b6   :  { %1276 = vrot.lane.b32.xlu1 %v1275_v30, %s2534_s3 }
0x15d0   :  { %v2344_v36 = vpop.f32.mrf.mxu0 }
0x15d2   :  { %v1265_v38 = vpop.f32.mrf.mxu0 }
0x1628   :  { %v2846_v31 = vpop.permute.xlu1 %1276 }
0x1629   :  { %2354 = vmatmul.mubr.msk.f32.vlgmr.msra.gmra.mxu0 %vm142_vm5, %v2846_v31 }
0x162a   :  { %2363 = vmatprep.mubr.msk.f32.mxu0 %vm2532_vm1, %v2531_v7 }
0x16e9   :  { %v1346_v39 = vpop.f32.mrf.mxu0 }
0x16ea   :  { %v1357_v40 = vrot.slane %v1346_v39, %v1356_v37  ;;  %v1956_v39 = vld [vmem:[%s2986_s5 + $0x40] sm:$0xff] }
0x16eb   :  { %v2355_v27 = vpop.f32.mrf.mxu0 }
0x16ec   :  { %v1358_v42 = vcombine.high %v1357_v40, %v1357_v40  ;;  %v1365_v43 = vrot.slane %v1357_v40, %v1356_v37  ;;  %v2092_v40 = vld [vmem:[%s2985_s4 + $0xcb] ss:$0 sm:$0xff] }
0x16ee   :  { %v1372_v44 = vrot.slane %v1358_v42, %v1356_v37  ;;  %v1376_v45 = vrot.slane %v1365_v43, %v1375_v41  ;;  %v1958_v37 = vld [vmem:[%s2986_s5 + $0x50] sm:$0xff] }
0x16f0   :  { %v1380_v47 = vrot.slane %v1372_v44, %v1375_v41  ;;  %v1383_v48 = vadd.f32 %v1376_v45, %v1265_v38  ;;  %v1957_v38 = vld [vmem:[%s2986_s5 + $0x48] sm:$0xff] }
0x16f1   :  { %v2094_v41 = vld [vmem:[%s2985_s4 + $0xcc] ss:$0 sm:$0xff] }
0x16f2   :  { %v1384_v49 = vadd.f32 %v2344_v36, %v1380_v47  ;;  %v1389_v15 = vadd.f32 %v2085_v46, %v1383_v48  ;;  %v1959_v36 = vld [vmem:[%s2986_s5 + $0x58] sm:$0xff] }
0x16f3   :  { %v1955_v48 = vld [vmem:[%s2986_s5 + $0x38] sm:$0xff] }
0x16f4   :  { %v1390_v50 = vadd.f32 %v2085_v46, %v1384_v49  ;;  %v1391_v51 = vmax.f32 %v1389_v15, 0.0  ;;  %v1954_v49 = vld [vmem:[%s2986_s5 + $0x30] sm:$0xff]  ;;  %v1953_v15 = vld [vmem:[%s2986_s5 + $0x28] sm:$0xff] }
0x16f6   :  { %v1392_v52 = vmax.f32 %v1390_v50, 0.0  ;;  %2357 = vmatpush3.xpose.msk.msra.mxu1 %vm142_vm5, %v1391_v51  ;;  %v2096_v50 = vld [vmem:[%s2986_s5 + $0x20] ss:$0 sm:$0xff] }
0x16f7   :  { %2366 = vmatprep.subr.mxu1 %v2531_v7 }
0x16f8   :  { %2362 = vmatpush3.xpose.msk.msra.mxu0 %vm142_vm5, %v1392_v52 }
0x16f9   :  { %2359 = vmatmul.mubr.msk.f32.vlgmr.msra.gmra.mxu1 %vm142_vm5, %v1012_v25  ;;  %2371 = vmatprep.subr.mxu0 %v2531_v7 }
0x16fa   :  { %2367 = vmatpush3.msra.mxu1 %v1191_v21  ;;  %2368 = vmatprep.mubr.msk.f32.mxu1 %vm2532_vm1, %v2531_v7 }
0x16fb   :  { %2364 = vmatmul.mubr.msk.f32.vlgmr.msra.gmra.mxu0 %vm142_vm5, %v1012_v25  ;;  %2376 = vmatprep.subr.mxu1 %v2531_v7 }
0x16fc   :  { %2372 = vmatpush3.msra.mxu0 %v1192_v20  ;;  %2373 = vmatprep.mubr.msk.f32.mxu0 %vm2532_vm1, %v2531_v7  ;;  %v1006_v20 = vld [vmem:[%s2985_s4 + $0xa8] sm:$0xff] }
0x16fd   :  { %2387 = vmatprep.subr.mxu0 %v2531_v7 }
0x17b9   :  { %v1465_v53 = vpop.f32.mrf.mxu1 }
0x17ba   :  { %v1543_v54 = vsel %vm1542_vm9, %v1465_v53, -inf }
0x17bb   :  { %1544 = vmax.xlane.f32.xlu1 %v1543_v54  ;;  %v1538_v55 = vpop.f32.mrf.mxu0  ;;  %v2360_v56 = vpop.f32.mrf.mxu1  ;;  %v2098_v54 = vld [vmem:[%s2986_s5 + $0x68] ss:$0 sm:$0xff] }
0x17bc   :  { %v1546_v57 = vsel %vm1542_vm9, %v1538_v55, -inf }
0x17bd   :  { %1547 = vmax.xlane.f32.xlu0 %v1546_v57  ;;  %v2365_v58 = vpop.f32.mrf.mxu0 }
0x1844   :  { %v1545_v59 = vpop.xlane.xlu1 %1544 }
0x1845   :  { %v1549_v60 = vsub.f32 %v1465_v53, %v1545_v59 }
0x1846   :  { %v1548_v61 = vpop.xlane.xlu0 %1547 }
0x1847   :  { %v1550_v62 = vsub.f32 %v1538_v55, %v1548_v61  ;;  %v1551_v63 = vmul.f32 1.442695, %v1549_v60 }
0x1849   :  { %v1553_v0 = vmul.f32 1.442695, %v1550_v62 }
0x184b   :  { %2500 = vpow2.f32 %v1553_v0 }
0x184c   :  { %2502 = vpow2.f32 %v1551_v63 }
0x1858   :  { %v2501_v1 = vpop.eup %2500 }
0x1859   :  { %v1558_v2 = vsel %vm1542_vm9, %v2501_v1, 0.0  ;;  %v2503_v5 = vpop.eup %2502 }
0x185a   :  { %1559 = vadd.xlane.f32.xlu0 %v1558_v2  ;;  %v1555_v3 = vsel %vm1542_vm9, %v2503_v5, 0.0 }
0x185e   :  { %1556 = vadd.xlane.f32.xlu0 %v1555_v3 }
0x18e3   :  { %v1560_v4 = vpop.xlane.xlu0 %1559 }
0x18e4   :  { %2504 = vrcp.f32 %v1560_v4 }
0x18e7   :  { %v1557_v9 = vpop.xlane.xlu0 %1556 }
0x18e8   :  { %2506 = vrcp.f32 %v1557_v9 }
0x18f1   :  { %v2505_v6 = vpop.eup %2504 }
0x18f2   :  { %v1564_v8 = vmul.f32 %v2505_v6, %v2501_v1 }
0x18f4   :  { %2374 = vmatmul.mubr.msk.f32.vlgmr.msra.gmra.mxu0 %vm1565_vm10, %v1564_v8 }
0x18f5   :  { %v2507_v10 = vpop.eup %2506  ;;  %2388 = vmatpush3.msra.mxu0 %v1009_v11  ;;  %2395 = vmatprep.mubr.msk.f32.mxu0 %vm2532_vm1, %v2531_v7 }
0x18f6   :  { %v1562_v13 = vmul.f32 %v2507_v10, %v2503_v5  ;;  %2389 = vmatprep.subr.mxu0 %v2531_v7 }
0x18f7   :  { %2390 = vmatpush3.msra.mxu0 %v1008_v18 }
0x18f8   :  { %2369 = vmatmul.mubr.msk.f32.vlgmr.msra.gmra.mxu1 %vm1565_vm10, %v1562_v13  ;;  %2391 = vmatprep.subr.mxu0 %v2531_v7 }
0x18f9   :  { %2377 = vmatpush3.msra.mxu1 %v1005_v12  ;;  %2384 = vmatprep.mubr.msk.f32.mxu1 %vm2532_vm1, %v2531_v7 }
0x18fa   :  { %2378 = vmatprep.subr.mxu1 %v2531_v7  ;;  %2392 = vmatpush3.msra.mxu0 %v1007_v19 }
0x18fb   :  { %2379 = vmatpush3.msra.mxu1 %v1004_v14  ;;  %2393 = vmatprep.subr.mxu0 %v2531_v7 }
0x18fc   :  { %2380 = vmatprep.subr.mxu1 %v2531_v7  ;;  %2394 = vmatpush3.msra.mxu0 %v1006_v20 }
0x18fd   :  { %2381 = vmatpush3.msra.mxu1 %v1003_v16  ;;  %2409 = vmatprep.subr.mxu0 %v2531_v7 }
0x18fe   :  { %2382 = vmatprep.subr.mxu1 %v2531_v7 }
0x18ff   :  { %2383 = vmatpush3.msra.mxu1 %v1002_v17 }
0x1900   :  { %2385 = vmatmul.mubr.msk.f32.vlgmr.msra.gmra.mxu1 %vm142_vm5, %v2846_v31  ;;  %2398 = vmatprep.subr.mxu1 %v2531_v7  ;;  %v1873_v31 = vld [vmem:[%s2986_s5 + $0x18] sm:$0xff] }
0x1901   :  { %2406 = vmatprep.mubr.msk.f32.mxu1 %vm2532_vm1, %v2531_v7  ;;  %2399 = vmatpush3.msra.mxu1 %v1873_v31 }
0x1902   :  { %2400 = vmatprep.subr.mxu1 %v2531_v7 }
0x1903   :  { %2401 = vmatpush3.msra.mxu1 %v1872_v32 }
0x1904   :  { %2402 = vmatprep.subr.mxu1 %v2531_v7 }
0x1905   :  { %2403 = vmatpush3.msra.mxu1 %v1871_v33 }
0x1906   :  { %2404 = vmatprep.subr.mxu1 %v2531_v7 }
0x1907   :  { %2405 = vmatpush3.msra.mxu1 %v1870_v34 }
0x19b4   :  { %v1708_v21 = vpop.f32.mrf.mxu0 }
0x19b5   :  { %v1793_v23 = vrot.slane %v1708_v21, 7 }
0x19b6   :  { %v2375_v22 = vpop.f32.mrf.mxu0 }
0x19b8   :  { %v1635_v24 = vpop.f32.mrf.mxu1 }
0x19b9   :  { %v1795_v26 = vsel %vm1794_vm11, %v1793_v23, %v1635_v24 }
0x19ba   :  { %v2370_v28 = vpop.f32.mrf.mxu1  ;;  %2396 = vmatmul.mubr.msk.f32.vlgmr.msra.gmra.mxu0 %vm142_vm5, %v1795_v26 }
0x19bb   :  { %2425 = vmatprep.mubr.msk.f32.mxu0 %vm2532_vm1, %v2531_v7  ;;  %2410 = vmatpush3.msra.mxu0 %v1960_v35 }
0x19bc   :  { %2411 = vmatprep.subr.mxu0 %v2531_v7 }
0x19bd   :  { %2412 = vmatpush3.msra.mxu0 %v1959_v36 }
0x19be   :  { %2413 = vmatprep.subr.mxu0 %v2531_v7 }
0x19bf   :  { %2414 = vmatpush3.msra.mxu0 %v1958_v37 }
0x19c0   :  { %v1782_v29 = vpop.f32.mrf.mxu1  ;;  %2415 = vmatprep.subr.mxu0 %v2531_v7 }
0x19c1   :  { %2416 = vmatpush3.msra.mxu0 %v1957_v38  ;;  %v1783_v27 = vadd.f32 %v2092_v40, %v1782_v29 }
0x19c2   :  { %v2386_v30 = vpop.f32.mrf.mxu1  ;;  %2417 = vmatprep.subr.mxu0 %v2531_v7 }
0x19c3   :  { %2418 = vmatpush3.msra.mxu0 %v1956_v39  ;;  %v1786_v45 = vmax.f32 %v1783_v27, 0.0 }
0x19c4   :  { %2419 = vmatprep.subr.mxu0 %v2531_v7 }
0x19c5   :  { %2420 = vmatpush3.msra.mxu0 %v1955_v48 }
0x19c6   :  { %2421 = vmatprep.subr.mxu0 %v2531_v7 }
0x19c7   :  { %2422 = vmatpush3.msra.mxu0 %v1954_v49 }
0x19c8   :  { %2423 = vmatprep.subr.mxu0 %v2531_v7 }
0x19c9   :  { %2424 = vmatpush3.msra.mxu0 %v1953_v15 }
0x1a7a   :  { %v1864_v42 = vpop.f32.mrf.mxu0 }
0x1a7b   :  { %v1865_v43 = vadd.f32 %v2094_v41, %v1864_v42 }
0x1a7c   :  { %v2397_v44 = vpop.f32.mrf.mxu0 }
0x1a7d   :  { %v1868_v46 = vmax.f32 %v1865_v43, 0.0 }
0x1a7f   :  { %v1869_v47 = vmul.f32 %v1868_v46, %v1786_v45 }
0x1a81   :  { %2407 = vmatmul.mubr.msk.f32.vlgmr.msra.gmra.mxu1 %vm142_vm5, %v1869_v47 }
0x1b41   :  { %v1948_v51 = vpop.f32.mrf.mxu1 }
0x1b42   :  { %v1949_v52 = vadd.f32 %v2096_v50, %v1948_v51 }
0x1b43   :  { %v2408_v25 = vpop.f32.mrf.mxu1 }
0x1b44   :  { %v1952_v53 = vmax.f32 %v1949_v52, 0.0 }
0x1b46   :  { %2426 = vmatmul.mubr.msk.f32.vlgmr.msra.gmra.mxu0 %vm1105_vm8, %v1952_v53 }
0x1c06   :  { %v2035_v55 = vpop.f32.mrf.mxu0 }
0x1c07   :  { %v2036_v7 = vadd.f32 %v2098_v54, %v2035_v55 }
0x1c08   :  { %v2427_v56 = vpop.f32.mrf.mxu0 }
0x1c09   :  { %2040 = vst.msk [vmem:[#allocation2] sm:$0x3] %vm2039_vm12, %v2036_v7 }
0x1c0a   :  { %2519 = shalt.err (!%p2516_p4)
}
0x1c0b   :  { %2050 = dma.vmem_to_hbm [thread:$0]  %s2048_s13, 32, %s2987_s6, [#allocation3]  }
0x1c0c   :  { %2528 = dma.done.wait [#allocation3], 32  }
0x1c0d   :  { %2529 = vsyncadd [#allocation3], 4294967264 }
0x1c0e   :  { %2054 = vsyncpa [#allocation3], 1 }

</bundles_post_ra>
